<compile_context>
chip_gen: v6e
topology: v6e:2x2x1
jax: 0.10.0
libtpu: 0.0.40
codegen_flags: <defaults>
</compile_context>

<pallas_src>
import jax
import jax.numpy as jnp
from jax.experimental import pallas as pl
from jax.experimental.pallas import tpu as pltpu


def _sigmul_conv1x1_kernel(gate_ref, x_ref, w_ref, o_ref):
    # gate_ref: (1, Cin)    pre-sigmoid per-channel gate logits (resident)
    # x_ref:    (Cin, HW)   activations (resident across grid steps)
    # w_ref:    (TCO, Cin)  one Cout tile of the 1x1-conv weight
    # o_ref:    (TCO, HW)   output tile
    g = jax.nn.sigmoid(gate_ref[...])          # EUP; 1344 elems, negligible
    wg = w_ref[...] * g                        # VPU sublane-broadcast: fold gate into weights
    # W(tco, Cin) @ X(Cin, HW): MXU-natural layout (K last on LHS, K second-to-last on RHS)
    o_ref[...] = jnp.dot(
        wg, x_ref[...], preferred_element_type=jnp.float32
    ).astype(o_ref.dtype)


def _default_tco(cout):
    """Pick the Cout tile per TPU generation (see perf notes above)."""
    try:
        kind = jax.devices()[0].device_kind.lower()
    except Exception:  # pragma: no cover - be robust if device query fails
        kind = ""
    # v6e: single TC -> grid=1 wins. v5e / v7x / unknown: grid=2 (overlap / core split).
    if "v6" in kind:
        tco = cout
    else:
        tco = cout // 2 if cout % 2 == 0 else cout
    # Keep tiles legal: multiple of 8 sublanes, dividing Cout.
    if tco % 8 != 0 or cout % tco != 0:
        tco = cout
    return tco


def fused_sigmoid_mul_conv1x1(x_nchw, gate_nchw, weight_oihw, *, tco=None):
    """x_nchw: (1, Cin, H, W); gate_nchw: (1, Cin, 1, 1); weight: (Cout, Cin, 1, 1)."""
    N, Cin, H, W = x_nchw.shape
    Cout = weight_oihw.shape[0]
    assert N == 1, "kernel written for batch 1 (module uses N=1)"
    assert gate_nchw.shape == (N, Cin, 1, 1)
    assert weight_oihw.shape == (Cout, Cin, 1, 1)

    if tco is None:
        tco = _default_tco(Cout)
    assert Cout % tco == 0 and tco % 8 == 0

    HW = H * W
    # Pure reshapes, no transposes (N == 1).
    x2d = x_nchw.reshape(Cin, HW)            # (1344, 196)
    gate2d = gate_nchw.reshape(1, Cin)       # (1, 1344)
    w2d = weight_oihw.reshape(Cout, Cin)     # (224, 1344)

    itemsize = 4  # f32
    bytes_accessed = itemsize * (Cin * HW + Cin + Cout * Cin + Cout * HW)
    cost = pl.CostEstimate(
        flops=2 * Cout * Cin * HW,
        transcendentals=Cin,
        bytes_accessed=bytes_accessed,
    )

    out2d = pl.pallas_call(
        _sigmul_conv1x1_kernel,
        out_shape=jax.ShapeDtypeStruct((Cout, HW), jnp.float32),
        grid=(Cout // tco,),
        in_specs=[
            # gate: resident (constant block index), fetched once
            pl.BlockSpec((1, Cin), lambda i: (0, 0)),
            # activations: resident, fetched once (~1.05 MB, fits VMEM easily)
            pl.BlockSpec((Cin, HW), lambda i: (0, 0)),
            # weight: tiled along Cout -> DMA of tile i+1 overlaps compute of tile i
            pl.BlockSpec((tco, Cin), lambda i: (i, 0)),
        ],
        out_specs=pl.BlockSpec((tco, HW), lambda i: (i, 0)),
        compiler_params=pltpu.CompilerParams(
            dimension_semantics=("parallel",)),  # v7x: split Cout tiles across cores
        cost_estimate=cost,
    )(gate2d, x2d, w2d)

    # (Cout, HW) -> (N, Cout, H, W): pure reshape, no transpose.
    return out2d.reshape(N, Cout, H, W)


if __name__ == "__main__":
    key = jax.random.PRNGKey(0)
    k1, k2, k3 = jax.random.split(key, 3)

    N, Cin, H, W, Cout = 1, 1344, 14, 14, 224

    x327 = jax.random.normal(k1, (N, Cin, H, W), dtype=jnp.float32)   # activations
    x331 = jax.random.normal(k2, (N, Cin, 1, 1), dtype=jnp.float32)   # SE gate logits
    # Conv2d(1344 -> 224, 1x1, bias=False) weight, deterministic init
    weight = jax.random.normal(k3, (Cout, Cin, 1, 1), dtype=jnp.float32) * 0.02

    fn = jax.jit(fused_sigmoid_mul_conv1x1)
    out = jax.block_until_ready(fn(x327, x331, weight))

    # Reference check in plain JAX (same math)
    gate = jax.nn.sigmoid(x331)
    gated = gate * x327
    ref = jnp.einsum("nchw,oc->nohw", gated, weight.reshape(Cout, Cin))
    assert out.shape == (N, Cout, H, W)
    assert jnp.allclose(out, ref, atol=1e-3, rtol=1e-3), float(
        jnp.max(jnp.abs(out - ref)))

    print("KERNEL_OK")
</pallas_src>

<mosaic_0001>
module attributes {stable_mosaic.version = 11 : i64} {
  func.func @_sigmul_conv1x1_kernel(%arg0: i32, %arg1: memref<1x1344xf32, #tpu.memory_space<vmem>>, %arg2: memref<1344x196xf32, #tpu.memory_space<vmem>>, %arg3: memref<112x1344xf32, #tpu.memory_space<vmem>>, %arg4: memref<112x196xf32, #tpu.memory_space<vmem>>) attributes {dimension_semantics = [#tpu.dimension_semantics<parallel>], iteration_bounds = array<i64: 2>, scalar_prefetch = 0 : i64, scratch_operands = 0 : i64, tpu.core_type = #tpu.core_type<tc>, window_params = [{pipeline_mode = #tpu.pipeline_mode<synchronous>, transform_indices = @transform_0, window_bounds = array<i64: 1, 1344>}, {pipeline_mode = #tpu.pipeline_mode<synchronous>, transform_indices = @transform_1, window_bounds = array<i64: 1344, 196>}, {transform_indices = @transform_2, window_bounds = array<i64: 112, 1344>}, {transform_indices = @transform_3, window_bounds = array<i64: 112, 196>}]} {
    %c0 = arith.constant 0 : index
    %c0_0 = arith.constant 0 : index
    %0 = vector.load %arg1[%c0, %c0_0] : memref<1x1344xf32, #tpu.memory_space<vmem>>, vector<1x1344xf32>
    %1 = arith.negf %0 : vector<1x1344xf32>
    %2 = math.exp %1 : vector<1x1344xf32>
    %cst = arith.constant 1.000000e+00 : f32
    %3 = vector.broadcast %cst : f32 to vector<1x1344xf32>
    %4 = arith.addf %3, %2 : vector<1x1344xf32>
    %5 = arith.divf %3, %4 : vector<1x1344xf32>
    %c0_1 = arith.constant 0 : index
    %c0_2 = arith.constant 0 : index
    %6 = vector.load %arg3[%c0_1, %c0_2] : memref<112x1344xf32, #tpu.memory_space<vmem>>, vector<112x1344xf32>
    %7 = vector.broadcast %5 : vector<1x1344xf32> to vector<112x1344xf32>
    %8 = arith.mulf %6, %7 : vector<112x1344xf32>
    %c0_3 = arith.constant 0 : index
    %c0_4 = arith.constant 0 : index
    %9 = vector.load %arg2[%c0_3, %c0_4] : memref<1344x196xf32, #tpu.memory_space<vmem>>, vector<1344x196xf32>
    %cst_5 = arith.constant dense<0.000000e+00> : vector<112x196xf32>
    %10 = tpu.matmul %8, %9, %cst_5 {dimension_numbers = #tpu.dot_dimension_numbers<[1], [0], [0], [1], [0, 0, 1, 1], [], []>} : vector<112x1344xf32>, vector<1344x196xf32>, vector<112x196xf32> -> vector<112x196xf32>
    %c0_6 = arith.constant 0 : index
    %c0_7 = arith.constant 0 : index
    %11 = vector.load %arg4[%c0_6, %c0_7] : memref<112x196xf32, #tpu.memory_space<vmem>>, vector<112x196xf32>
    tpu.vector_store %arg4[%c0_6, %c0_7], %10 {strides = array<i32>} : memref<112x196xf32, #tpu.memory_space<vmem>>, vector<112x196xf32>,
    return
  }
  func.func @transform_0(%arg0: i32) -> (i32, i32) {
    %c0_i32 = arith.constant 0 : i32
    %c0_i32_0 = arith.constant 0 : i32
    %c0_i32_1 = arith.constant 0 : i32
    return %c0_i32, %c0_i32_0 : i32, i32
  }
  func.func @transform_1(%arg0: i32) -> (i32, i32) {
    %c0_i32 = arith.constant 0 : i32
    %c0_i32_0 = arith.constant 0 : i32
    %c0_i32_1 = arith.constant 0 : i32
    return %c0_i32, %c0_i32_0 : i32, i32
  }
  func.func @transform_2(%arg0: i32) -> (i32, i32) {
    %c0_i32 = arith.constant 0 : i32
    %c0_i32_0 = arith.constant 0 : i32
    return %arg0, %c0_i32 : i32, i32
  }
  func.func @transform_3(%arg0: i32) -> (i32, i32) {
    %c0_i32 = arith.constant 0 : i32
    %c0_i32_0 = arith.constant 0 : i32
    return %arg0, %c0_i32 : i32, i32
  }
}

</mosaic_0001>

<bundles_post_ra>
// kernel: fused_sigmoid_mul_conv1x1.1
= control target key start
LH: loop header
LB: loop body
LE: loop exit
PB: predicated region body
PF: predicated region fallthrough
CT: control target
= control target key end

     0   :  { %s1992_s12 = smov 0   ;;  %s3708_s0 = inlined_call_operand.vmem [shape: f32[1,1344], index: 0, kind: input, shape index: {}]   ;;  %s3709_s1 = inlined_call_operand.vmem [shape: f32[1344,196], index: 1, kind: input, shape index: {}]   ;;  %s3710_s2 = inlined_call_operand.vmem [shape: f32[224,1344], index: 2, kind: input, shape index: {}]   ;;  %s3711_s3 = inlined_call_operand.vmem [shape: f32[224,196], index: 3, kind: output, shape index: {}]  }
   0x1 LB: > { %s1918_s13 = sadd.s32 4294967295, %s1969_s12   ;;  %p1922_p0 = scmp.ge.s32.totalorder %s1969_s12, 1  ;;  %s1969_s12 = sphi %s1992_s12, %s13_s12  }
   0x2   : > { %p139_p1 = scmp.lt.s32.totalorder %s1969_s12, 3 }
   0x4   : > { %p140_p2 = pnand %p1922_p0, %p139_p1 }
   0x6   : > { %143 = sbr.rel (%p140_p2) target bundleno = 493 (0x1ed), region = 32 }
   0xb   : > { %v589_v0 = vld [vmem:[%s3709_s1 + $0xf8] sm:$0xff]  ;;  %v588_v2 = vld [vmem:[%s3709_s1 + $0xf0] sm:$0xff]  ;;  %v587_v4 = vld [vmem:[%s3709_s1 + $0xe8] sm:$0xff]  ;;  %s2347_s19 = smul.u32 14, %s1918_s13  ;;  %vm894_vm0 = vcmask 523264   ;;  %vm1832_vm1 = vcmask 556032  }
   0xc   : > { %v653_v1 = vld [vmem:[%s3709_s1 + $0x2f8] sm:$0xff]  ;;  %937 = vmatprep.subr.mxu0 %v589_v0  ;;  %v652_v3 = vld [vmem:[%s3709_s1 + $0x2f0] sm:$0xff]  ;;  %v651_v5 = vld [vmem:[%s3709_s1 + $0x2e8] sm:$0xff] }
   0xd   : > { %1086 = vmatprep.subr.mxu1 %v653_v1  ;;  %938 = vmatpush1.msra.mxu0 %v588_v2  ;;  %v586_v6 = vld [vmem:[%s3709_s1 + $0xe0] sm:$0xff]  ;;  %v585_v8 = vld [vmem:[%s3709_s1 + $0xd8] sm:$0xff]  ;;  %v584_v10 = vld [vmem:[%s3709_s1 + $0xd0] sm:$0xff]  ;;  %p166_p3 = scmp.lt.s32.totalorder %s2347_s19, 27 }
   0xe   : > { %1087 = vmatpush1.msra.mxu1 %v652_v3  ;;  %v650_v7 = vld [vmem:[%s3709_s1 + $0x2e0] sm:$0xff]  ;;  %939 = vmatprep.subr.mxu0 %v587_v4  ;;  %v649_v9 = vld [vmem:[%s3709_s1 + $0x2d8] sm:$0xff]  ;;  %v648_v11 = vld [vmem:[%s3709_s1 + $0x2d0] sm:$0xff] }
   0xf   : > { %1088 = vmatprep.subr.mxu1 %v651_v5  ;;  %940 = vmatpush1.msra.mxu0 %v586_v6  ;;  %v583_v12 = vld [vmem:[%s3709_s1 + $0xc8] sm:$0xff]  ;;  %v582_v14 = vld [vmem:[%s3709_s1 + $0xc0] sm:$0xff]  ;;  %v581_v16 = vld [vmem:[%s3709_s1 + $0xb8] sm:$0xff]  ;;  %s3777_s19 = smov (!%p166_p3, %s2347_s19), 27 }
  0x10   : > { %1089 = vmatpush1.msra.mxu1 %v650_v7  ;;  %v647_v13 = vld [vmem:[%s3709_s1 + $0x2c8] sm:$0xff]  ;;  %941 = vmatprep.subr.mxu0 %v585_v8  ;;  %v646_v15 = vld [vmem:[%s3709_s1 + $0x2c0] sm:$0xff]  ;;  %v645_v17 = vld [vmem:[%s3709_s1 + $0x2b8] sm:$0xff]  ;;  %s1945_s13 = smul.u32 88, %s3777_s19 }
  0x11   : > { %1090 = vmatprep.subr.mxu1 %v649_v9  ;;  %942 = vmatpush1.msra.mxu0 %v584_v10  ;;  %v580_v18 = vld [vmem:[%s3709_s1 + $0xb0] sm:$0xff]  ;;  %v579_v20 = vld [vmem:[%s3709_s1 + $0xa8] sm:$0xff]  ;;  %v578_v22 = vld [vmem:[%s3709_s1 + $0xa0] sm:$0xff] }
  0x12   : > { %1091 = vmatpush1.msra.mxu1 %v648_v11  ;;  %943 = vmatprep.subr.mxu0 %v583_v12  ;;  %v644_v19 = vld [vmem:[%s3709_s1 + $0x2b0] sm:$0xff]  ;;  %v643_v21 = vld [vmem:[%s3709_s1 + $0x2a8] sm:$0xff]  ;;  %v642_v23 = vld [vmem:[%s3709_s1 + $0x2a0] sm:$0xff]  ;;  %s2409_s29 = scalar_lea.vmem %s3710_s2, %s1945_s13 }
  0x13   : > { %1092 = vmatprep.subr.mxu1 %v647_v13  ;;  %944 = vmatpush1.msra.mxu0 %v582_v14  ;;  %v577_v24 = vld [vmem:[%s3709_s1 + $0x98] sm:$0xff]  ;;  %v576_v26 = vld [vmem:[%s3709_s1 + $0x90] sm:$0xff]  ;;  %v575_v28 = vld [vmem:[%s3709_s1 + $0x88] sm:$0xff] }
  0x14   : > { %1093 = vmatpush1.msra.mxu1 %v646_v15  ;;  %945 = vmatprep.subr.mxu0 %v581_v16  ;;  %v641_v25 = vld [vmem:[%s3709_s1 + $0x298] sm:$0xff]  ;;  %v640_v27 = vld [vmem:[%s3709_s1 + $0x290] sm:$0xff]  ;;  %v639_v29 = vld [vmem:[%s3709_s1 + $0x288] sm:$0xff] }
  0x15   : > { %1094 = vmatprep.subr.mxu1 %v645_v17  ;;  %946 = vmatpush1.msra.mxu0 %v580_v18  ;;  %v574_v30 = vld [vmem:[%s3709_s1 + $0x80] sm:$0xff]  ;;  %v573_v32 = vld [vmem:[%s3709_s1 + $0x78] sm:$0xff]  ;;  %v572_v34 = vld [vmem:[%s3709_s1 + $0x70] sm:$0xff] }
  0x16   : > { %1095 = vmatpush1.msra.mxu1 %v644_v19  ;;  %947 = vmatprep.subr.mxu0 %v579_v20  ;;  %v638_v31 = vld [vmem:[%s3709_s1 + $0x280] sm:$0xff]  ;;  %v637_v33 = vld [vmem:[%s3709_s1 + $0x278] sm:$0xff]  ;;  %v636_v35 = vld [vmem:[%s3709_s1 + $0x270] sm:$0xff] }
  0x17   : > { %1096 = vmatprep.subr.mxu1 %v643_v21  ;;  %948 = vmatpush1.msra.mxu0 %v578_v22  ;;  %v571_v36 = vld [vmem:[%s3709_s1 + $0x68] sm:$0xff]  ;;  %v570_v38 = vld [vmem:[%s3709_s1 + $0x60] sm:$0xff]  ;;  %v569_v40 = vld [vmem:[%s3709_s1 + $0x58] sm:$0xff] }
  0x18   : > { %1097 = vmatpush1.msra.mxu1 %v642_v23  ;;  %949 = vmatprep.subr.mxu0 %v577_v24  ;;  %v635_v37 = vld [vmem:[%s3709_s1 + $0x268] sm:$0xff]  ;;  %v634_v39 = vld [vmem:[%s3709_s1 + $0x260] sm:$0xff]  ;;  %v633_v41 = vld [vmem:[%s3709_s1 + $0x258] sm:$0xff] }
  0x19   : > { %1098 = vmatprep.subr.mxu1 %v641_v25  ;;  %950 = vmatpush1.msra.mxu0 %v576_v26  ;;  %v568_v42 = vld [vmem:[%s3709_s1 + $0x50] sm:$0xff]  ;;  %v567_v44 = vld [vmem:[%s3709_s1 + $0x48] sm:$0xff]  ;;  %v566_v46 = vld [vmem:[%s3709_s1 + $0x40] sm:$0xff] }
  0x1a   : > { %1099 = vmatpush1.msra.mxu1 %v640_v27  ;;  %951 = vmatprep.subr.mxu0 %v575_v28  ;;  %v632_v43 = vld [vmem:[%s3709_s1 + $0x250] sm:$0xff]  ;;  %v631_v45 = vld [vmem:[%s3709_s1 + $0x248] sm:$0xff]  ;;  %v630_v47 = vld [vmem:[%s3709_s1 + $0x240] sm:$0xff] }
  0x1b   : > { %1100 = vmatprep.subr.mxu1 %v639_v29  ;;  %952 = vmatpush1.msra.mxu0 %v574_v30  ;;  %v565_v48 = vld [vmem:[%s3709_s1 + $0x38] sm:$0xff]  ;;  %v564_v50 = vld [vmem:[%s3709_s1 + $0x30] sm:$0xff]  ;;  %v563_v52 = vld [vmem:[%s3709_s1 + $0x28] sm:$0xff] }
  0x1c   : > { %1101 = vmatpush1.msra.mxu1 %v638_v31  ;;  %953 = vmatprep.subr.mxu0 %v573_v32  ;;  %v629_v49 = vld [vmem:[%s3709_s1 + $0x238] sm:$0xff]  ;;  %v628_v51 = vld [vmem:[%s3709_s1 + $0x230] sm:$0xff]  ;;  %v627_v53 = vld [vmem:[%s3709_s1 + $0x228] sm:$0xff] }
  0x1d   : > { %1102 = vmatprep.subr.mxu1 %v637_v33  ;;  %954 = vmatpush1.msra.mxu0 %v572_v34  ;;  %v562_v54 = vld [vmem:[%s3709_s1 + $0x20] sm:$0xff]  ;;  %v561_v56 = vld [vmem:[%s3709_s1 + $0x18] sm:$0xff]  ;;  %v560_v58 = vld [vmem:[%s3709_s1 + $0x10] sm:$0xff] }
  0x1e   : > { %1103 = vmatpush1.msra.mxu1 %v636_v35  ;;  %955 = vmatprep.subr.mxu0 %v571_v36  ;;  %v626_v55 = vld [vmem:[%s3709_s1 + $0x220] sm:$0xff]  ;;  %v625_v57 = vld [vmem:[%s3709_s1 + $0x218] sm:$0xff]  ;;  %v624_v59 = vld [vmem:[%s3709_s1 + $0x210] sm:$0xff] }
  0x1f   : > { %1104 = vmatprep.subr.mxu1 %v635_v37  ;;  %956 = vmatpush1.msra.mxu0 %v570_v38  ;;  %v559_v60 = vld [vmem:[%s3709_s1 + $0x8] sm:$0xff]  ;;  %v558_v62 = vld [vmem:[%s3709_s1] sm:$0xff]  ;;  %v621_v0 = vld [vmem:[%s3709_s1 + $0x1f8] sm:$0xff] }
  0x20   : > { %1105 = vmatpush1.msra.mxu1 %v634_v39  ;;  %957 = vmatprep.subr.mxu0 %v569_v40  ;;  %v623_v61 = vld [vmem:[%s3709_s1 + $0x208] sm:$0xff]  ;;  %v622_v63 = vld [vmem:[%s3709_s1 + $0x200] sm:$0xff]  ;;  %v685_v1 = vld [vmem:[%s3709_s1 + $0x3f8] sm:$0xff] }
  0x21   : > { %1106 = vmatprep.subr.mxu1 %v633_v41  ;;  %958 = vmatpush1.msra.mxu0 %v568_v42  ;;  %v620_v2 = vld [vmem:[%s3709_s1 + $0x1f0] sm:$0xff]  ;;  %v619_v4 = vld [vmem:[%s3709_s1 + $0x1e8] sm:$0xff]  ;;  %v618_v6 = vld [vmem:[%s3709_s1 + $0x1e0] sm:$0xff] }
  0x22   : > { %1107 = vmatpush1.msra.mxu1 %v632_v43  ;;  %959 = vmatprep.subr.mxu0 %v567_v44  ;;  %v684_v3 = vld [vmem:[%s3709_s1 + $0x3f0] sm:$0xff]  ;;  %v683_v5 = vld [vmem:[%s3709_s1 + $0x3e8] sm:$0xff]  ;;  %v682_v7 = vld [vmem:[%s3709_s1 + $0x3e0] sm:$0xff] }
  0x23   : > { %1108 = vmatprep.subr.mxu1 %v631_v45  ;;  %960 = vmatpush1.msra.mxu0 %v566_v46  ;;  %v617_v8 = vld [vmem:[%s3709_s1 + $0x1d8] sm:$0xff]  ;;  %v616_v10 = vld [vmem:[%s3709_s1 + $0x1d0] sm:$0xff]  ;;  %v615_v12 = vld [vmem:[%s3709_s1 + $0x1c8] sm:$0xff] }
  0x24   : > { %1109 = vmatpush1.msra.mxu1 %v630_v47  ;;  %961 = vmatprep.subr.mxu0 %v565_v48  ;;  %v681_v9 = vld [vmem:[%s3709_s1 + $0x3d8] sm:$0xff]  ;;  %v680_v11 = vld [vmem:[%s3709_s1 + $0x3d0] sm:$0xff]  ;;  %v679_v13 = vld [vmem:[%s3709_s1 + $0x3c8] sm:$0xff] }
  0x25   : > { %1110 = vmatprep.subr.mxu1 %v629_v49  ;;  %962 = vmatpush1.msra.mxu0 %v564_v50  ;;  %v614_v14 = vld [vmem:[%s3709_s1 + $0x1c0] sm:$0xff]  ;;  %v613_v16 = vld [vmem:[%s3709_s1 + $0x1b8] sm:$0xff]  ;;  %v612_v18 = vld [vmem:[%s3709_s1 + $0x1b0] sm:$0xff] }
  0x26   : > { %1111 = vmatpush1.msra.mxu1 %v628_v51  ;;  %963 = vmatprep.subr.mxu0 %v563_v52  ;;  %v678_v15 = vld [vmem:[%s3709_s1 + $0x3c0] sm:$0xff]  ;;  %v677_v17 = vld [vmem:[%s3709_s1 + $0x3b8] sm:$0xff]  ;;  %v676_v19 = vld [vmem:[%s3709_s1 + $0x3b0] sm:$0xff] }
  0x27   : > { %1112 = vmatprep.subr.mxu1 %v627_v53  ;;  %964 = vmatpush1.msra.mxu0 %v562_v54  ;;  %v611_v20 = vld [vmem:[%s3709_s1 + $0x1a8] sm:$0xff]  ;;  %v610_v22 = vld [vmem:[%s3709_s1 + $0x1a0] sm:$0xff]  ;;  %v609_v24 = vld [vmem:[%s3709_s1 + $0x198] sm:$0xff] }
  0x28   : > { %1113 = vmatpush1.msra.mxu1 %v626_v55  ;;  %965 = vmatprep.subr.mxu0 %v561_v56  ;;  %v675_v21 = vld [vmem:[%s3709_s1 + $0x3a8] sm:$0xff]  ;;  %v674_v23 = vld [vmem:[%s3709_s1 + $0x3a0] sm:$0xff]  ;;  %v673_v25 = vld [vmem:[%s3709_s1 + $0x398] sm:$0xff] }
  0x29   : > { %1114 = vmatprep.subr.mxu1 %v625_v57  ;;  %966 = vmatpush1.msra.mxu0 %v560_v58  ;;  %v179_v26 = vld [vmem:[%s3708_s0] sm:$0xff]  ;;  %v608_v27 = vld [vmem:[%s3709_s1 + $0x190] sm:$0xff]  ;;  %v607_v30 = vld [vmem:[%s3709_s1 + $0x188] sm:$0xff] }
  0x2a   : > { %1115 = vmatpush1.msra.mxu1 %v624_v59  ;;  %967 = vmatprep.subr.mxu0 %v559_v60  ;;  %v672_v28 = vld [vmem:[%s3709_s1 + $0x390] sm:$0xff]  ;;  %v1926_v29 = vmul.f32 -1.442695, %v179_v26  ;;  %v671_v31 = vld [vmem:[%s3709_s1 + $0x388] sm:$0xff]  ;;  %v606_v32 = vld [vmem:[%s3709_s1 + $0x180] sm:$0xff] }
  0x2b   : > { %1116 = vmatprep.subr.mxu1 %v623_v61  ;;  %968 = vmatpush1.msra.mxu0 %v558_v62  ;;  %v670_v33 = vld [vmem:[%s3709_s1 + $0x380] sm:$0xff]  ;;  %v605_v34 = vld [vmem:[%s3709_s1 + $0x178] sm:$0xff]  ;;  %v604_v36 = vld [vmem:[%s3709_s1 + $0x170] sm:$0xff] }
  0x2c   : > { %1117 = vmatpush1.msra.mxu1 %v622_v63  ;;  %969 = vmatprep.subr.mxu0 %v621_v0  ;;  %1955 = vpow2.f32 %v1926_v29  ;;  %v669_v35 = vld [vmem:[%s3709_s1 + $0x378] sm:$0xff]  ;;  %v668_v37 = vld [vmem:[%s3709_s1 + $0x370] sm:$0xff]  ;;  %v603_v38 = vld [vmem:[%s3709_s1 + $0x168] sm:$0xff] }
  0x2d   : > { %1118 = vmatprep.subr.mxu1 %v685_v1  ;;  %970 = vmatpush2.msra.mxu0 %v620_v2  ;;  %v667_v39 = vld [vmem:[%s3709_s1 + $0x368] sm:$0xff]  ;;  %v602_v40 = vld [vmem:[%s3709_s1 + $0x160] sm:$0xff]  ;;  %v601_v42 = vld [vmem:[%s3709_s1 + $0x158] sm:$0xff] }
  0x2e   : > { %1119 = vmatpush2.msra.mxu1 %v684_v3  ;;  %971 = vmatprep.subr.mxu0 %v619_v4  ;;  %v666_v41 = vld [vmem:[%s3709_s1 + $0x360] sm:$0xff]  ;;  %v665_v43 = vld [vmem:[%s3709_s1 + $0x358] sm:$0xff]  ;;  %v600_v44 = vld [vmem:[%s3709_s1 + $0x150] sm:$0xff] }
  0x2f   : > { %1120 = vmatprep.subr.mxu1 %v683_v5  ;;  %972 = vmatpush2.msra.mxu0 %v618_v6  ;;  %v664_v45 = vld [vmem:[%s3709_s1 + $0x350] sm:$0xff]  ;;  %v599_v46 = vld [vmem:[%s3709_s1 + $0x148] sm:$0xff]  ;;  %v598_v48 = vld [vmem:[%s3709_s1 + $0x140] sm:$0xff]  ;;  %v349_v6 = vlaneseq }
  0x30   : > { %1121 = vmatpush2.msra.mxu1 %v682_v7  ;;  %973 = vmatprep.subr.mxu0 %v617_v8  ;;  %v663_v47 = vld [vmem:[%s3709_s1 + $0x348] sm:$0xff]  ;;  %v662_v49 = vld [vmem:[%s3709_s1 + $0x340] sm:$0xff]  ;;  %v597_v50 = vld [vmem:[%s3709_s1 + $0x138] sm:$0xff] }
  0x31   : > { %1122 = vmatprep.subr.mxu1 %v681_v9  ;;  %974 = vmatpush2.msra.mxu0 %v616_v10  ;;  %v661_v51 = vld [vmem:[%s3709_s1 + $0x338] sm:$0xff]  ;;  %v596_v52 = vld [vmem:[%s3709_s1 + $0x130] sm:$0xff]  ;;  %v595_v54 = vld [vmem:[%s3709_s1 + $0x128] sm:$0xff]  ;;  %v2404_v7 = vshrl.u32 %v349_v6, 7 }
  0x32   : > { %1123 = vmatpush2.msra.mxu1 %v680_v11  ;;  %975 = vmatprep.subr.mxu0 %v615_v12  ;;  %v660_v53 = vld [vmem:[%s3709_s1 + $0x330] sm:$0xff]  ;;  %v659_v55 = vld [vmem:[%s3709_s1 + $0x328] sm:$0xff]  ;;  %v594_v56 = vld [vmem:[%s3709_s1 + $0x120] sm:$0xff] }
  0x33   : > { %1124 = vmatprep.subr.mxu1 %v679_v13  ;;  %976 = vmatpush2.msra.mxu0 %v614_v14  ;;  %v658_v57 = vld [vmem:[%s3709_s1 + $0x320] sm:$0xff]  ;;  %v593_v59 = vld [vmem:[%s3709_s1 + $0x118] sm:$0xff]  ;;  %v592_v61 = vld [vmem:[%s3709_s1 + $0x110] sm:$0xff]  ;;  %v355_v8 = vsub.s32 1, %v2404_v7  ;;  %v363_v9 = vsub.s32 3, %v2404_v7  ;;  %v351_v10 = vsub.s32 0, %v2404_v7 }
  0x34   : > { %1125 = vmatpush2.msra.mxu1 %v678_v15  ;;  %977 = vmatprep.subr.mxu0 %v613_v16  ;;  %v657_v60 = vld [vmem:[%s3709_s1 + $0x318] sm:$0xff]  ;;  %v656_v62 = vld [vmem:[%s3709_s1 + $0x310] sm:$0xff]  ;;  %v591_v0 = vld [vmem:[%s3709_s1 + $0x108] sm:$0xff]  ;;  %v359_v11 = vsub.s32 2, %v2404_v7  ;;  %v371_v12 = vsub.s32 5, %v2404_v7  ;;  %v367_v13 = vsub.s32 4, %v2404_v7 }
  0x35   : > { %1126 = vmatprep.subr.mxu1 %v677_v17  ;;  %978 = vmatpush2.msra.mxu0 %v612_v18  ;;  %v655_v1 = vld [vmem:[%s3709_s1 + $0x308] sm:$0xff]  ;;  %v590_v2 = vld [vmem:[%s3709_s1 + $0x100] sm:$0xff]  ;;  %v717_v4 = vld [vmem:[%s3709_s1 + $0x4f8] sm:$0xff] }
  0x36   : > { %1127 = vmatpush2.msra.mxu1 %v676_v19  ;;  %979 = vmatprep.subr.mxu0 %v611_v20  ;;  %v654_v3 = vld [vmem:[%s3709_s1 + $0x300] sm:$0xff]  ;;  %v781_v5 = vld [vmem:[%s3709_s1 + $0x6f8] sm:$0xff]  ;;  %v194_v14 = vld [vmem:[%s2409_s29 + $0x8] sm:$0xff] }
  0x37   : > { %1128 = vmatprep.subr.mxu1 %v675_v21  ;;  %980 = vmatpush2.msra.mxu0 %v610_v22  ;;  %v196_v16 = vld [vmem:[%s2409_s29 + $0x18] sm:$0xff]  ;;  %v193_v17 = vld [vmem:[%s2409_s29] sm:$0xff]  ;;  %v195_v18 = vld [vmem:[%s2409_s29 + $0x10] sm:$0xff] }
  0x38   : > { %1129 = vmatpush2.msra.mxu1 %v674_v23  ;;  %981 = vmatprep.subr.mxu0 %v609_v24  ;;  %v716_v29 = vld [vmem:[%s3709_s1 + $0x4f0] sm:$0xff] }
  0x39   : > { %1130 = vmatprep.subr.mxu1 %v673_v25  ;;  %982 = vmatpush2.msra.mxu0 %v608_v27  ;;  %v1956_v58 = vpop.eup %1955 }
  0x3a   : > { %1131 = vmatpush2.msra.mxu1 %v672_v28  ;;  %983 = vmatprep.subr.mxu0 %v607_v30  ;;  %v187_v63 = vadd.f32 1.0, %v1956_v58  ;;  %v780_v30 = vld [vmem:[%s3709_s1 + $0x6f0] sm:$0xff]  ;;  %v218_v58 = vld [vmem:[%s2409_s29 + $0xc8] sm:$0xff] }
  0x3b   : > { %1132 = vmatprep.subr.mxu1 %v671_v31  ;;  %984 = vmatpush2.msra.mxu0 %v606_v32  ;;  %v715_v31 = vld [vmem:[%s3709_s1 + $0x4e8] sm:$0xff] }
  0x3c   : > { %1133 = vmatpush2.msra.mxu1 %v670_v33  ;;  %985 = vmatprep.subr.mxu0 %v605_v34  ;;  %1957 = vrcp.f32 %v187_v63  ;;  %v779_v32 = vld [vmem:[%s3709_s1 + $0x6e8] sm:$0xff]  ;;  %v714_v33 = vld [vmem:[%s3709_s1 + $0x4e0] sm:$0xff] }
  0x3d   : > { %1134 = vmatprep.subr.mxu1 %v669_v35  ;;  %986 = vmatpush2.msra.mxu0 %v604_v36  ;;  %v778_v34 = vld [vmem:[%s3709_s1 + $0x6e0] sm:$0xff]  ;;  %v713_v35 = vld [vmem:[%s3709_s1 + $0x4d8] sm:$0xff] }
  0x3e   : > { %1135 = vmatpush2.msra.mxu1 %v668_v37  ;;  %987 = vmatprep.subr.mxu0 %v603_v38  ;;  %v777_v36 = vld [vmem:[%s3709_s1 + $0x6d8] sm:$0xff]  ;;  %v205_v37 = vld [vmem:[%s2409_s29 + $0x60] sm:$0xff]  ;;  %v712_v38 = vld [vmem:[%s3709_s1 + $0x4d0] sm:$0xff] }
  0x3f   : > { %1136 = vmatprep.subr.mxu1 %v667_v39  ;;  %988 = vmatpush2.msra.mxu0 %v602_v40  ;;  %v776_v39 = vld [vmem:[%s3709_s1 + $0x6d0] sm:$0xff] }
  0x40   : > { %1137 = vmatpush2.msra.mxu1 %v666_v41  ;;  %989 = vmatprep.subr.mxu0 %v601_v42  ;;  %v207_v40 = vld [vmem:[%s2409_s29 + $0x70] sm:$0xff]  ;;  %v711_v41 = vld [vmem:[%s3709_s1 + $0x4c8] sm:$0xff]  ;;  %v710_v42 = vld [vmem:[%s3709_s1 + $0x4c0] sm:$0xff] }
  0x41   : > { %1138 = vmatprep.subr.mxu1 %v665_v43  ;;  %990 = vmatpush2.msra.mxu0 %v600_v44  ;;  %v775_v43 = vld [vmem:[%s3709_s1 + $0x6c8] sm:$0xff]  ;;  %v774_v44 = vld [vmem:[%s3709_s1 + $0x6c0] sm:$0xff] }
  0x42   : > { %1139 = vmatpush2.msra.mxu1 %v664_v45  ;;  %991 = vmatprep.subr.mxu0 %v599_v46  ;;  %v204_v46 = vld [vmem:[%s2409_s29 + $0x58] sm:$0xff] }
  0x43   : > { %1140 = vmatprep.subr.mxu1 %v663_v47  ;;  %992 = vmatpush2.msra.mxu0 %v598_v48  ;;  %v206_v47 = vld [vmem:[%s2409_s29 + $0x68] sm:$0xff]  ;;  %v709_v48 = vld [vmem:[%s3709_s1 + $0x4b8] sm:$0xff] }
  0x44   : > { %1141 = vmatpush2.msra.mxu1 %v662_v49  ;;  %993 = vmatprep.subr.mxu0 %v597_v50  ;;  %v708_v50 = vld [vmem:[%s3709_s1 + $0x4b0] sm:$0xff] }
  0x45   : > { %1142 = vmatprep.subr.mxu1 %v661_v51  ;;  %994 = vmatpush2.msra.mxu0 %v596_v52  ;;  %v707_v51 = vld [vmem:[%s3709_s1 + $0x4a8] sm:$0xff]  ;;  %v773_v52 = vld [vmem:[%s3709_s1 + $0x6b8] sm:$0xff] }
  0x46   : > { %1143 = vmatpush2.msra.mxu1 %v660_v53  ;;  %995 = vmatprep.subr.mxu0 %v595_v54 }
  0x47   : > { %1144 = vmatprep.subr.mxu1 %v659_v55  ;;  %996 = vmatpush2.msra.mxu0 %v594_v56  ;;  %v216_v55 = vld [vmem:[%s2409_s29 + $0xb8] sm:$0xff]  ;;  %v379_v56 = vsub.s32 7, %v2404_v7 }
  0x48   : > { %1145 = vmatpush2.msra.mxu1 %v658_v57  ;;  %997 = vmatprep.subr.mxu0 %v593_v59  ;;  %v375_v57 = vsub.s32 6, %v2404_v7  ;;  %v706_v59 = vld [vmem:[%s3709_s1 + $0x4a0] sm:$0xff]  ;;  %v848_v7 = vld [vmem:[%s3709_s1 + $0x910] sm:$0xff] }
  0x49   : > { %1146 = vmatprep.subr.mxu1 %v657_v60  ;;  %998 = vmatpush2.msra.mxu0 %v592_v61  ;;  %v2418_v15 = vpop.eup %1957  ;;  %v772_v60 = vld [vmem:[%s3709_s1 + $0x6b0] sm:$0xff]  ;;  %v705_v61 = vld [vmem:[%s3709_s1 + $0x498] sm:$0xff] }
  0x4a   : > { %1147 = vmatpush2.msra.mxu1 %v656_v62  ;;  %999 = vmatprep.subr.mxu0 %v591_v0  ;;  %v2426_v19 = vrot.slane %v2418_v15, %v355_v8  ;;  %v2429_v20 = vrot.slane %v2418_v15, %v363_v9  ;;  %v2434_v21 = vrot.slane %v2418_v15, %v351_v10  ;;  %v771_v62 = vld [vmem:[%s3709_s1 + $0x6a8] sm:$0xff]  ;;  %v215_v0 = vld [vmem:[%s2409_s29 + $0xb0] sm:$0xff] }
  0x4b   : > { %1148 = vmatprep.subr.mxu1 %v655_v1  ;;  %1000 = vmatpush2.msra.mxu0 %v590_v2  ;;  %v2439_v22 = vrot.slane %v2418_v15, %v359_v11  ;;  %v2442_v23 = vrot.slane %v2418_v15, %v371_v12  ;;  %v2445_v24 = vrot.slane %v2418_v15, %v367_v13  ;;  %v217_v1 = vld [vmem:[%s2409_s29 + $0xc0] sm:$0xff]  ;;  %v704_v2 = vld [vmem:[%s3709_s1 + $0x490] sm:$0xff]  ;;  %v703_v9 = vld [vmem:[%s3709_s1 + $0x488] sm:$0xff] }
  0x4c   : > { %1149 = vmatpush2.msra.mxu1 %v654_v3  ;;  %1235 = vmatprep.subr.mxu0 %v717_v4  ;;  %v405_v25 = vmul.f32 %v2426_v19, %v194_v14  ;;  %v407_v26 = vmul.f32 %v2429_v20, %v196_v16  ;;  %v404_v27 = vmul.f32 %v2434_v21, %v193_v17  ;;  %v770_v3 = vld [vmem:[%s3709_s1 + $0x6a0] sm:$0xff]  ;;  %v769_v12 = vld [vmem:[%s3709_s1 + $0x698] sm:$0xff] }
  0x4d   : > { %1384 = vmatprep.subr.mxu1 %v781_v5  ;;  %v406_v28 = vmul.f32 %v2439_v22, %v195_v18  ;;  %v416_v45 = vmul.f32 %v2426_v19, %v205_v37  ;;  %v418_v49 = vmul.f32 %v2429_v20, %v207_v40  ;;  %v415_v53 = vmul.f32 %v2434_v21, %v204_v46  ;;  %v229_v16 = vld [vmem:[%s2409_s29 + $0x120] sm:$0xff]  ;;  %v768_v18 = vld [vmem:[%s3709_s1 + $0x690] sm:$0xff]  ;;  %v238_v37 = vld [vmem:[%s2409_s29 + $0x168] sm:$0xff] }
  0x4e   : > { %1001 = vmatprep.mubr.f32.mxu0 %v405_v25  ;;  %1150 = vmatprep.mubr.f32.mxu1 %v407_v26  ;;  %v417_v54 = vmul.f32 %v2439_v22, %v206_v47  ;;  %v427_v63 = vmul.f32 %v2426_v19, %v216_v55  ;;  %v429_v4 = vmul.f32 %v2429_v20, %v218_v58  ;;  %v702_v17 = vld [vmem:[%s3709_s1 + $0x480] sm:$0xff]  ;;  %v701_v25 = vld [vmem:[%s3709_s1 + $0x478] sm:$0xff]  ;;  %v767_v26 = vld [vmem:[%s3709_s1 + $0x688] sm:$0xff] }
  0x4f   : > { %1002 = vmatmul.mubr.f32.vlgmr.msra.gmra.mxu0 %v404_v27  ;;  %1151 = vmatmul.mubr.f32.vlgmr.msra.gmra.mxu1 %v406_v28  ;;  %v2540_v5 = vrot.slane %v2418_v15, %v379_v56  ;;  %v2543_v6 = vrot.slane %v2418_v15, %v375_v57  ;;  %v426_v13 = vmul.f32 %v2434_v21, %v215_v0  ;;  %v227_v15 = vld [vmem:[%s2409_s29 + $0x110] sm:$0xff]  ;;  %v226_v27 = vld [vmem:[%s2409_s29 + $0x108] sm:$0xff]  ;;  %v228_v28 = vld [vmem:[%s2409_s29 + $0x118] sm:$0xff] }
  0x50   : > { %1236 = vmatpush1.msra.mxu0 %v716_v29  ;;  %1385 = vmatpush1.msra.mxu1 %v780_v30  ;;  %v428_v14 = vmul.f32 %v2439_v22, %v217_v1  ;;  %v700_v29 = vld [vmem:[%s3709_s1 + $0x470] sm:$0xff]  ;;  %v766_v30 = vld [vmem:[%s3709_s1 + $0x680] sm:$0xff]  ;;  %v449_v47 = vmul.f32 %v2426_v19, %v238_v37  ;;  %v693_v57 = vld [vmem:[%s3709_s1 + $0x438] sm:$0xff] }
  0x51   : > { %1237 = vmatprep.subr.mxu0 %v715_v31  ;;  %1386 = vmatprep.subr.mxu1 %v779_v32  ;;  %v438_v31 = vmul.f32 %v2426_v19, %v227_v15  ;;  %v440_v32 = vmul.f32 %v2429_v20, %v229_v16  ;;  %v764_v40 = vld [vmem:[%s3709_s1 + $0x670] sm:$0xff]  ;;  %v762_v46 = vld [vmem:[%s3709_s1 + $0x660] sm:$0xff]  ;;  %v759_v58 = vld [vmem:[%s3709_s1 + $0x648] sm:$0xff] }
  0x52   : > { %1238 = vmatpush1.msra.mxu0 %v714_v33  ;;  %1387 = vmatpush1.msra.mxu1 %v778_v34  ;;  %v699_v33 = vld [vmem:[%s3709_s1 + $0x468] sm:$0xff]  ;;  %v765_v34 = vld [vmem:[%s3709_s1 + $0x678] sm:$0xff]  ;;  %v694_v55 = vld [vmem:[%s3709_s1 + $0x440] sm:$0xff] }
  0x53   : > { %1239 = vmatprep.subr.mxu0 %v713_v35  ;;  %1388 = vmatprep.subr.mxu1 %v777_v36  ;;  %v437_v35 = vmul.f32 %v2434_v21, %v226_v27  ;;  %v439_v36 = vmul.f32 %v2439_v22, %v228_v28  ;;  %v760_v56 = vld [vmem:[%s3709_s1 + $0x650] sm:$0xff]  ;;  %v691_v1 = vld [vmem:[%s3709_s1 + $0x428] sm:$0xff]  ;;  %v689_v15 = vld [vmem:[%s3709_s1 + $0x418] sm:$0xff] }
  0x54   : > { %1240 = vmatpush1.msra.mxu0 %v712_v38  ;;  %1389 = vmatpush1.msra.mxu1 %v776_v39  ;;  %v240_v38 = vld [vmem:[%s2409_s29 + $0x178] sm:$0xff]  ;;  %v698_v39 = vld [vmem:[%s3709_s1 + $0x460] sm:$0xff]  ;;  %v755_v16 = vld [vmem:[%s3709_s1 + $0x628] sm:$0xff] }
  0x55   : > { %1241 = vmatprep.subr.mxu0 %v711_v41  ;;  %1390 = vmatprep.subr.mxu1 %v775_v43  ;;  %v697_v41 = vld [vmem:[%s3709_s1 + $0x458] sm:$0xff]  ;;  %v237_v43 = vld [vmem:[%s2409_s29 + $0x160] sm:$0xff] }
  0x56   : > { %1242 = vmatpush1.msra.mxu0 %v710_v42  ;;  %1391 = vmatpush1.msra.mxu1 %v774_v44  ;;  %v763_v42 = vld [vmem:[%s3709_s1 + $0x668] sm:$0xff]  ;;  %v239_v44 = vld [vmem:[%s2409_s29 + $0x170] sm:$0xff]  ;;  %v749_v37 = vld [vmem:[%s3709_s1 + $0x5f8] sm:$0xff] }
  0x57   : > { %1243 = vmatprep.subr.mxu0 %v709_v48  ;;  %1007 = vmatprep.mubr.f32.mxu0 %v416_v45  ;;  %v696_v45 = vld [vmem:[%s3709_s1 + $0x450] sm:$0xff]  ;;  %v451_v48 = vmul.f32 %v2429_v20, %v240_v38  ;;  %v751_v38 = vld [vmem:[%s3709_s1 + $0x608] sm:$0xff] }
  0x58   : > { %1244 = vmatpush1.msra.mxu0 %v708_v50  ;;  %1156 = vmatprep.mubr.f32.mxu1 %v418_v49  ;;  %v695_v49 = vld [vmem:[%s3709_s1 + $0x448] sm:$0xff]  ;;  %v761_v50 = vld [vmem:[%s3709_s1 + $0x658] sm:$0xff] }
  0x59   : > { %1245 = vmatprep.subr.mxu0 %v707_v51  ;;  %1392 = vmatprep.subr.mxu1 %v773_v52  ;;  %v448_v51 = vmul.f32 %v2434_v21, %v237_v43  ;;  %v450_v52 = vmul.f32 %v2439_v22, %v239_v44 }
  0x5a   : > { %1008 = vmatmul.mubr.f32.gmra.mxu0 %v415_v53  ;;  %1157 = vmatmul.mubr.f32.gmra.mxu1 %v417_v54  ;;  %v249_v53 = vld [vmem:[%s2409_s29 + $0x1c0] sm:$0xff]  ;;  %v251_v54 = vld [vmem:[%s2409_s29 + $0x1d0] sm:$0xff] }
  0x5b   : > { %1246 = vmatpush1.msra.mxu0 %v706_v59  ;;  %1393 = vmatpush1.msra.mxu1 %v772_v60  ;;  %v248_v59 = vld [vmem:[%s2409_s29 + $0x1b8] sm:$0xff]  ;;  %v250_v60 = vld [vmem:[%s2409_s29 + $0x1c8] sm:$0xff]  ;;  %v462_v0 = vmul.f32 %v2429_v20, %v251_v54 }
  0x5c   : > { %1247 = vmatprep.subr.mxu0 %v705_v61  ;;  %1394 = vmatprep.subr.mxu1 %v771_v62  ;;  %v692_v61 = vld [vmem:[%s3709_s1 + $0x430] sm:$0xff]  ;;  %v758_v62 = vld [vmem:[%s3709_s1 + $0x640] sm:$0xff]  ;;  %v811_v54 = vld [vmem:[%s3709_s1 + $0x7e8] sm:$0xff] }
  0x5d   : > { %1248 = vmatpush1.msra.mxu0 %v704_v2  ;;  %1395 = vmatpush1.msra.mxu1 %v770_v3  ;;  %v757_v2 = vld [vmem:[%s3709_s1 + $0x638] sm:$0xff]  ;;  %v459_v3 = vmul.f32 %v2434_v21, %v248_v59 }
  0x5e   : > { %1013 = vmatprep.mubr.f32.mxu0 %v427_v63  ;;  %1162 = vmatprep.mubr.f32.mxu1 %v429_v4  ;;  %v460_v63 = vmul.f32 %v2426_v19, %v249_v53  ;;  %v461_v4 = vmul.f32 %v2439_v22, %v250_v60  ;;  %v745_v53 = vld [vmem:[%s3709_s1 + $0x5d8] sm:$0xff] }
  0x5f   : > { %1249 = vmatprep.subr.mxu0 %v703_v9  ;;  %1396 = vmatprep.subr.mxu1 %v769_v12  ;;  %v260_v9 = vld [vmem:[%s2409_s29 + $0x218] sm:$0xff]  ;;  %v262_v12 = vld [vmem:[%s2409_s29 + $0x228] sm:$0xff] }
  0x60   : > { %1014 = vmatmul.mubr.f32.gmra.mxu0 %v426_v13  ;;  %1163 = vmatmul.mubr.f32.gmra.mxu1 %v428_v14  ;;  %v690_v13 = vld [vmem:[%s3709_s1 + $0x420] sm:$0xff]  ;;  %v756_v14 = vld [vmem:[%s3709_s1 + $0x630] sm:$0xff]  ;;  %v471_v27 = vmul.f32 %v2426_v19, %v260_v9  ;;  %v473_v28 = vmul.f32 %v2429_v20, %v262_v12  ;;  %v741_v9 = vld [vmem:[%s3709_s1 + $0x5b8] sm:$0xff] }
  0x61   : > { %1250 = vmatpush1.msra.mxu0 %v702_v17  ;;  %1397 = vmatpush1.msra.mxu1 %v768_v18  ;;  %v259_v17 = vld [vmem:[%s2409_s29 + $0x210] sm:$0xff]  ;;  %v261_v18 = vld [vmem:[%s2409_s29 + $0x220] sm:$0xff]  ;;  %v807_v12 = vld [vmem:[%s3709_s1 + $0x7c8] sm:$0xff] }
  0x62   : > { %1251 = vmatprep.subr.mxu0 %v701_v25  ;;  %1398 = vmatprep.subr.mxu1 %v767_v26  ;;  %v688_v25 = vld [vmem:[%s3709_s1 + $0x410] sm:$0xff]  ;;  %v754_v26 = vld [vmem:[%s3709_s1 + $0x620] sm:$0xff] }
  0x63   : > { %1252 = vmatpush1.msra.mxu0 %v700_v29  ;;  %1399 = vmatpush1.msra.mxu1 %v766_v30  ;;  %v687_v29 = vld [vmem:[%s3709_s1 + $0x408] sm:$0xff]  ;;  %v753_v30 = vld [vmem:[%s3709_s1 + $0x618] sm:$0xff] }
  0x64   : > { %1019 = vmatprep.mubr.f32.mxu0 %v438_v31  ;;  %1168 = vmatprep.mubr.f32.mxu1 %v440_v32  ;;  %v470_v31 = vmul.f32 %v2434_v21, %v259_v17  ;;  %v472_v32 = vmul.f32 %v2439_v22, %v261_v18 }
  0x65   : > { %1253 = vmatprep.subr.mxu0 %v699_v33  ;;  %1400 = vmatprep.subr.mxu1 %v765_v34  ;;  %v271_v33 = vld [vmem:[%s2409_s29 + $0x270] sm:$0xff]  ;;  %v273_v34 = vld [vmem:[%s2409_s29 + $0x280] sm:$0xff] }
  0x66   : > { %1020 = vmatmul.mubr.f32.gmra.mxu0 %v437_v35  ;;  %1169 = vmatmul.mubr.f32.gmra.mxu1 %v439_v36  ;;  %v686_v35 = vld [vmem:[%s3709_s1 + $0x400] sm:$0xff]  ;;  %v752_v36 = vld [vmem:[%s3709_s1 + $0x610] sm:$0xff]  ;;  %v482_v43 = vmul.f32 %v2426_v19, %v271_v33  ;;  %v484_v44 = vmul.f32 %v2429_v20, %v273_v34  ;;  %v737_v33 = vld [vmem:[%s3709_s1 + $0x598] sm:$0xff] }
  0x67   : > { %1254 = vmatpush1.msra.mxu0 %v698_v39  ;;  %1401 = vmatpush1.msra.mxu1 %v764_v40  ;;  %v270_v39 = vld [vmem:[%s2409_s29 + $0x268] sm:$0xff]  ;;  %v272_v40 = vld [vmem:[%s2409_s29 + $0x278] sm:$0xff] }
  0x68   : > { %1255 = vmatprep.subr.mxu0 %v697_v41  ;;  %1402 = vmatprep.subr.mxu1 %v763_v42  ;;  %v748_v41 = vld [vmem:[%s3709_s1 + $0x5f0] sm:$0xff]  ;;  %v750_v42 = vld [vmem:[%s3709_s1 + $0x600] sm:$0xff]  ;;  %v803_v34 = vld [vmem:[%s3709_s1 + $0x7a8] sm:$0xff] }
  0x69   : > { %1256 = vmatpush1.msra.mxu0 %v696_v45  ;;  %1403 = vmatpush1.msra.mxu1 %v762_v46  ;;  %v747_v45 = vld [vmem:[%s3709_s1 + $0x5e8] sm:$0xff]  ;;  %v813_v46 = vld [vmem:[%s3709_s1 + $0x7f8] sm:$0xff] }
  0x6a   : > { %1025 = vmatprep.mubr.f32.mxu0 %v449_v47  ;;  %1174 = vmatprep.mubr.f32.mxu1 %v451_v48  ;;  %v481_v47 = vmul.f32 %v2434_v21, %v270_v39  ;;  %v483_v48 = vmul.f32 %v2439_v22, %v272_v40 }
  0x6b   : > { %1257 = vmatprep.subr.mxu0 %v695_v49  ;;  %1404 = vmatprep.subr.mxu1 %v761_v50  ;;  %v282_v49 = vld [vmem:[%s2409_s29 + $0x2c8] sm:$0xff]  ;;  %v284_v50 = vld [vmem:[%s2409_s29 + $0x2d8] sm:$0xff] }
  0x6c   : > { %1026 = vmatmul.mubr.f32.gmra.mxu0 %v448_v51  ;;  %1175 = vmatmul.mubr.f32.gmra.mxu1 %v450_v52  ;;  %v746_v51 = vld [vmem:[%s3709_s1 + $0x5e0] sm:$0xff]  ;;  %v812_v52 = vld [vmem:[%s3709_s1 + $0x7f0] sm:$0xff]  ;;  %v493_v59 = vmul.f32 %v2426_v19, %v282_v49  ;;  %v495_v60 = vmul.f32 %v2429_v20, %v284_v50  ;;  %v733_v49 = vld [vmem:[%s3709_s1 + $0x578] sm:$0xff] }
  0x6d   : > { %1258 = vmatpush1.msra.mxu0 %v694_v55  ;;  %1405 = vmatpush1.msra.mxu1 %v760_v56  ;;  %v281_v55 = vld [vmem:[%s2409_s29 + $0x2c0] sm:$0xff]  ;;  %v283_v56 = vld [vmem:[%s2409_s29 + $0x2d0] sm:$0xff]  ;;  %v799_v50 = vld [vmem:[%s3709_s1 + $0x788] sm:$0xff] }
  0x6e   : > { %1259 = vmatprep.subr.mxu0 %v693_v57  ;;  %1406 = vmatprep.subr.mxu1 %v759_v58  ;;  %v744_v57 = vld [vmem:[%s3709_s1 + $0x5d0] sm:$0xff]  ;;  %v810_v58 = vld [vmem:[%s3709_s1 + $0x7e0] sm:$0xff] }
  0x6f   : > { %1260 = vmatpush1.msra.mxu0 %v692_v61  ;;  %1407 = vmatpush1.msra.mxu1 %v758_v62  ;;  %v743_v61 = vld [vmem:[%s3709_s1 + $0x5c8] sm:$0xff]  ;;  %v809_v62 = vld [vmem:[%s3709_s1 + $0x7d8] sm:$0xff] }
  0x70   : > { %1031 = vmatprep.mubr.f32.mxu0 %v460_v63  ;;  %1180 = vmatprep.mubr.f32.mxu1 %v462_v0  ;;  %v492_v63 = vmul.f32 %v2434_v21, %v281_v55  ;;  %v494_v0 = vmul.f32 %v2439_v22, %v283_v56 }
  0x71   : > { %1261 = vmatprep.subr.mxu0 %v691_v1  ;;  %1408 = vmatprep.subr.mxu1 %v757_v2  ;;  %v293_v1 = vld [vmem:[%s2409_s29 + $0x320] sm:$0xff]  ;;  %v295_v2 = vld [vmem:[%s2409_s29 + $0x330] sm:$0xff] }
  0x72   : > { %1032 = vmatmul.mubr.f32.gmra.mxu0 %v459_v3  ;;  %1181 = vmatmul.mubr.f32.gmra.mxu1 %v461_v4  ;;  %v742_v3 = vld [vmem:[%s3709_s1 + $0x5c0] sm:$0xff]  ;;  %v808_v4 = vld [vmem:[%s3709_s1 + $0x7d0] sm:$0xff]  ;;  %v504_v17 = vmul.f32 %v2426_v19, %v293_v1  ;;  %v506_v18 = vmul.f32 %v2429_v20, %v295_v2  ;;  %v729_v1 = vld [vmem:[%s3709_s1 + $0x558] sm:$0xff] }
  0x73   : > { %1262 = vmatpush1.msra.mxu0 %v690_v13  ;;  %1409 = vmatpush1.msra.mxu1 %v756_v14  ;;  %v292_v13 = vld [vmem:[%s2409_s29 + $0x318] sm:$0xff]  ;;  %v294_v14 = vld [vmem:[%s2409_s29 + $0x328] sm:$0xff] }
  0x74   : > { %1263 = vmatprep.subr.mxu0 %v689_v15  ;;  %1410 = vmatprep.subr.mxu1 %v755_v16  ;;  %v740_v15 = vld [vmem:[%s3709_s1 + $0x5b0] sm:$0xff]  ;;  %v806_v16 = vld [vmem:[%s3709_s1 + $0x7c0] sm:$0xff]  ;;  %v795_v2 = vld [vmem:[%s3709_s1 + $0x768] sm:$0xff] }
  0x75   : > { %1264 = vmatpush1.msra.mxu0 %v688_v25  ;;  %1411 = vmatpush1.msra.mxu1 %v754_v26  ;;  %v739_v25 = vld [vmem:[%s3709_s1 + $0x5a8] sm:$0xff]  ;;  %v805_v26 = vld [vmem:[%s3709_s1 + $0x7b8] sm:$0xff] }
  0x76   : > { %1037 = vmatprep.mubr.f32.mxu0 %v471_v27  ;;  %1186 = vmatprep.mubr.f32.mxu1 %v473_v28  ;;  %v503_v27 = vmul.f32 %v2434_v21, %v292_v13  ;;  %v505_v28 = vmul.f32 %v2439_v22, %v294_v14 }
  0x77   : > { %1265 = vmatprep.subr.mxu0 %v687_v29  ;;  %1412 = vmatprep.subr.mxu1 %v753_v30  ;;  %v304_v29 = vld [vmem:[%s2409_s29 + $0x378] sm:$0xff]  ;;  %v306_v30 = vld [vmem:[%s2409_s29 + $0x388] sm:$0xff] }
  0x78   : > { %1038 = vmatmul.mubr.f32.gmra.mxu0 %v470_v31  ;;  %1187 = vmatmul.mubr.f32.gmra.mxu1 %v472_v32  ;;  %v738_v31 = vld [vmem:[%s3709_s1 + $0x5a0] sm:$0xff]  ;;  %v804_v32 = vld [vmem:[%s3709_s1 + $0x7b0] sm:$0xff]  ;;  %v515_v39 = vmul.f32 %v2426_v19, %v304_v29  ;;  %v517_v40 = vmul.f32 %v2429_v20, %v306_v30  ;;  %v725_v29 = vld [vmem:[%s3709_s1 + $0x538] sm:$0xff] }
  0x79   : > { %1266 = vmatpush1.msra.mxu0 %v686_v35  ;;  %1413 = vmatpush1.msra.mxu1 %v752_v36  ;;  %v303_v35 = vld [vmem:[%s2409_s29 + $0x370] sm:$0xff]  ;;  %v305_v36 = vld [vmem:[%s2409_s29 + $0x380] sm:$0xff]  ;;  %v791_v30 = vld [vmem:[%s3709_s1 + $0x748] sm:$0xff] }
  0x7a   : > { %1267 = vmatprep.subr.mxu0 %v749_v37  ;;  %1414 = vmatprep.subr.mxu1 %v751_v38  ;;  %v736_v37 = vld [vmem:[%s3709_s1 + $0x590] sm:$0xff]  ;;  %v802_v38 = vld [vmem:[%s3709_s1 + $0x7a0] sm:$0xff] }
  0x7b   : > { %1268 = vmatpush2.msra.mxu0 %v748_v41  ;;  %1415 = vmatpush1.msra.mxu1 %v750_v42  ;;  %v735_v41 = vld [vmem:[%s3709_s1 + $0x588] sm:$0xff]  ;;  %v801_v42 = vld [vmem:[%s3709_s1 + $0x798] sm:$0xff] }
  0x7c   : > { %1043 = vmatprep.mubr.f32.mxu0 %v482_v43  ;;  %1192 = vmatprep.mubr.f32.mxu1 %v484_v44  ;;  %v514_v43 = vmul.f32 %v2434_v21, %v303_v35  ;;  %v516_v44 = vmul.f32 %v2439_v22, %v305_v36 }
  0x7d   : > { %1269 = vmatprep.subr.mxu0 %v747_v45  ;;  %1416 = vmatprep.subr.mxu1 %v813_v46  ;;  %v315_v45 = vld [vmem:[%s2409_s29 + $0x3d0] sm:$0xff]  ;;  %v317_v46 = vld [vmem:[%s2409_s29 + $0x3e0] sm:$0xff] }
  0x7e   : > { %1044 = vmatmul.mubr.f32.gmra.mxu0 %v481_v47  ;;  %1193 = vmatmul.mubr.f32.gmra.mxu1 %v483_v48  ;;  %v734_v47 = vld [vmem:[%s3709_s1 + $0x580] sm:$0xff]  ;;  %v800_v48 = vld [vmem:[%s3709_s1 + $0x790] sm:$0xff]  ;;  %v526_v55 = vmul.f32 %v2426_v19, %v315_v45  ;;  %v528_v56 = vmul.f32 %v2429_v20, %v317_v46  ;;  %v719_v45 = vld [vmem:[%s3709_s1 + $0x508] sm:$0xff] }
  0x7f   : > { %1270 = vmatpush2.msra.mxu0 %v746_v51  ;;  %1417 = vmatpush2.msra.mxu1 %v812_v52  ;;  %v314_v51 = vld [vmem:[%s2409_s29 + $0x3c8] sm:$0xff]  ;;  %v316_v52 = vld [vmem:[%s2409_s29 + $0x3d8] sm:$0xff] }
  0x80   : > { %1271 = vmatprep.subr.mxu0 %v745_v53  ;;  %1418 = vmatprep.subr.mxu1 %v811_v54  ;;  %v732_v53 = vld [vmem:[%s3709_s1 + $0x570] sm:$0xff]  ;;  %v798_v54 = vld [vmem:[%s3709_s1 + $0x780] sm:$0xff]  ;;  %v785_v46 = vld [vmem:[%s3709_s1 + $0x718] sm:$0xff] }
  0x81   : > { %1272 = vmatpush2.msra.mxu0 %v744_v57  ;;  %1419 = vmatpush2.msra.mxu1 %v810_v58  ;;  %v731_v57 = vld [vmem:[%s3709_s1 + $0x568] sm:$0xff]  ;;  %v797_v58 = vld [vmem:[%s3709_s1 + $0x778] sm:$0xff] }
  0x82   : > { %1049 = vmatprep.mubr.f32.mxu0 %v493_v59  ;;  %1198 = vmatprep.mubr.f32.mxu1 %v495_v60  ;;  %v525_v59 = vmul.f32 %v2434_v21, %v314_v51  ;;  %v527_v60 = vmul.f32 %v2439_v22, %v316_v52  ;;  %v199_v51 = vld [vmem:[%s2409_s29 + $0x30] sm:$0xff] }
  0x83   : > { %1273 = vmatprep.subr.mxu0 %v743_v61  ;;  %1420 = vmatprep.subr.mxu1 %v809_v62  ;;  %v326_v61 = vld [vmem:[%s2409_s29 + $0x428] sm:$0xff]  ;;  %v328_v62 = vld [vmem:[%s2409_s29 + $0x438] sm:$0xff]  ;;  %v784_v52 = vld [vmem:[%s3709_s1 + $0x710] sm:$0xff] }
  0x84   : > { %1050 = vmatmul.mubr.f32.gmra.mxu0 %v492_v63  ;;  %1199 = vmatmul.mubr.f32.gmra.mxu1 %v494_v0  ;;  %v730_v63 = vld [vmem:[%s3709_s1 + $0x560] sm:$0xff]  ;;  %v796_v0 = vld [vmem:[%s3709_s1 + $0x770] sm:$0xff]  ;;  %v537_v13 = vmul.f32 %v2426_v19, %v326_v61  ;;  %v539_v14 = vmul.f32 %v2429_v20, %v328_v62 }
  0x85   : > { %1274 = vmatpush2.msra.mxu0 %v742_v3  ;;  %1421 = vmatpush2.msra.mxu1 %v808_v4  ;;  %v325_v3 = vld [vmem:[%s2409_s29 + $0x420] sm:$0xff]  ;;  %v327_v4 = vld [vmem:[%s2409_s29 + $0x430] sm:$0xff] }
  0x86   : > { %1275 = vmatprep.subr.mxu0 %v741_v9  ;;  %1422 = vmatprep.subr.mxu1 %v807_v12  ;;  %v728_v9 = vld [vmem:[%s3709_s1 + $0x550] sm:$0xff]  ;;  %v794_v12 = vld [vmem:[%s3709_s1 + $0x760] sm:$0xff] }
  0x87   : > { %1276 = vmatpush2.msra.mxu0 %v740_v15  ;;  %1423 = vmatpush2.msra.mxu1 %v806_v16  ;;  %v727_v15 = vld [vmem:[%s3709_s1 + $0x548] sm:$0xff]  ;;  %v793_v16 = vld [vmem:[%s3709_s1 + $0x758] sm:$0xff]  ;;  %v844_v61 = vld [vmem:[%s3709_s1 + $0x8f0] sm:$0xff] }
  0x88   : > { %1055 = vmatprep.mubr.f32.mxu0 %v504_v17  ;;  %1204 = vmatprep.mubr.f32.mxu1 %v506_v18  ;;  %v536_v17 = vmul.f32 %v2434_v21, %v325_v3  ;;  %v538_v18 = vmul.f32 %v2439_v22, %v327_v4  ;;  %v842_v3 = vld [vmem:[%s3709_s1 + $0x8e0] sm:$0xff] }
  0x89   : > { %1277 = vmatprep.subr.mxu0 %v739_v25  ;;  %1424 = vmatprep.subr.mxu1 %v805_v26  ;;  %v337_v25 = vld [vmem:[%s2409_s29 + $0x480] sm:$0xff]  ;;  %v339_v26 = vld [vmem:[%s2409_s29 + $0x490] sm:$0xff] }
  0x8a   : > { %1056 = vmatmul.mubr.f32.gmra.mxu0 %v503_v27  ;;  %1205 = vmatmul.mubr.f32.gmra.mxu1 %v505_v28  ;;  %v726_v27 = vld [vmem:[%s3709_s1 + $0x540] sm:$0xff]  ;;  %v792_v28 = vld [vmem:[%s3709_s1 + $0x750] sm:$0xff]  ;;  %v548_v35 = vmul.f32 %v2426_v19, %v337_v25  ;;  %v550_v36 = vmul.f32 %v2429_v20, %v339_v26 }
  0x8b   : > { %1278 = vmatpush2.msra.mxu0 %v738_v31  ;;  %1425 = vmatpush2.msra.mxu1 %v804_v32  ;;  %v336_v31 = vld [vmem:[%s2409_s29 + $0x478] sm:$0xff]  ;;  %v338_v32 = vld [vmem:[%s2409_s29 + $0x488] sm:$0xff]  ;;  %v722_v20 = vld [vmem:[%s3709_s1 + $0x520] sm:$0xff] }
  0x8c   : > { %1279 = vmatprep.subr.mxu0 %v737_v33  ;;  %1426 = vmatprep.subr.mxu1 %v803_v34  ;;  %v724_v33 = vld [vmem:[%s3709_s1 + $0x530] sm:$0xff]  ;;  %v790_v34 = vld [vmem:[%s3709_s1 + $0x740] sm:$0xff]  ;;  %v549_v19 = vmul.f32 %v2439_v22, %v338_v32  ;;  %v787_v22 = vld [vmem:[%s3709_s1 + $0x728] sm:$0xff] }
  0x8d   : > { %1280 = vmatpush2.msra.mxu0 %v736_v37  ;;  %1427 = vmatpush2.msra.mxu1 %v802_v38  ;;  %v723_v37 = vld [vmem:[%s3709_s1 + $0x528] sm:$0xff]  ;;  %v789_v38 = vld [vmem:[%s3709_s1 + $0x738] sm:$0xff]  ;;  %v221_v25 = vld [vmem:[%s2409_s29 + $0xe0] sm:$0xff] }
  0x8e   : > { %1061 = vmatprep.mubr.f32.mxu0 %v515_v39  ;;  %1210 = vmatprep.mubr.f32.mxu1 %v517_v40  ;;  %v547_v39 = vmul.f32 %v2434_v21, %v336_v31  ;;  %v788_v40 = vld [vmem:[%s3709_s1 + $0x730] sm:$0xff]  ;;  %v721_v21 = vld [vmem:[%s3709_s1 + $0x518] sm:$0xff]  ;;  %v838_v26 = vld [vmem:[%s3709_s1 + $0x8c0] sm:$0xff] }
  0x8f   : > { %1281 = vmatprep.subr.mxu0 %v735_v41  ;;  %1428 = vmatprep.subr.mxu1 %v801_v42  ;;  %v198_v41 = vld [vmem:[%s2409_s29 + $0x28] sm:$0xff]  ;;  %v197_v42 = vld [vmem:[%s2409_s29 + $0x20] sm:$0xff]  ;;  %v836_v31 = vld [vmem:[%s3709_s1 + $0x8b0] sm:$0xff] }
  0x90   : > { %1062 = vmatmul.mubr.f32.gmra.mxu0 %v514_v43  ;;  %1211 = vmatmul.mubr.f32.gmra.mxu1 %v516_v44  ;;  %v720_v43 = vld [vmem:[%s3709_s1 + $0x510] sm:$0xff]  ;;  %v786_v44 = vld [vmem:[%s3709_s1 + $0x720] sm:$0xff]  ;;  %v893_v32 = vld [vmem:[%s3709_s1 + $0xa78] sm:$0xff] }
  0x91   : > { %1282 = vmatpush2.msra.mxu0 %v734_v47  ;;  %1429 = vmatpush2.msra.mxu1 %v800_v48  ;;  %v409_v47 = vmul.f32 %v2442_v23, %v198_v41  ;;  %v200_v48 = vld [vmem:[%s2409_s29 + $0x38] sm:$0xff] }
  0x92   : > { %1283 = vmatprep.subr.mxu0 %v733_v49  ;;  %1430 = vmatprep.subr.mxu1 %v799_v50  ;;  %v718_v49 = vld [vmem:[%s3709_s1 + $0x500] sm:$0xff]  ;;  %v408_v50 = vmul.f32 %v2445_v24, %v197_v42  ;;  %v833_v41 = vld [vmem:[%s3709_s1 + $0x898] sm:$0xff]  ;;  %v832_v42 = vld [vmem:[%s3709_s1 + $0x890] sm:$0xff] }
  0x93   : > { %1284 = vmatpush2.msra.mxu0 %v732_v53  ;;  %1431 = vmatpush2.msra.mxu1 %v798_v54  ;;  %v209_v53 = vld [vmem:[%s2409_s29 + $0x80] sm:$0xff]  ;;  %v783_v54 = vld [vmem:[%s3709_s1 + $0x708] sm:$0xff] }
  0x94   : > { %1067 = vmatprep.mubr.f32.mxu0 %v526_v55  ;;  %1216 = vmatprep.mubr.f32.mxu1 %v528_v56  ;;  %v845_v55 = vld [vmem:[%s3709_s1 + $0x8f8] sm:$0xff]  ;;  %v411_v56 = vmul.f32 %v2540_v5, %v200_v48  ;;  %v420_v62 = vmul.f32 %v2442_v23, %v209_v53 }
  0x95   : > { %1285 = vmatprep.subr.mxu0 %v731_v57  ;;  %1432 = vmatprep.subr.mxu1 %v797_v58  ;;  %v211_v57 = vld [vmem:[%s2409_s29 + $0x90] sm:$0xff]  ;;  %v782_v58 = vld [vmem:[%s3709_s1 + $0x700] sm:$0xff] }
  0x96   : > { %1068 = vmatmul.mubr.f32.gmra.mxu0 %v525_v59  ;;  %1217 = vmatmul.mubr.f32.gmra.mxu1 %v527_v60  ;;  %v410_v59 = vmul.f32 %v2543_v6, %v199_v51  ;;  %v208_v60 = vld [vmem:[%s2409_s29 + $0x78] sm:$0xff]  ;;  %v253_v51 = vld [vmem:[%s2409_s29 + $0x1e0] sm:$0xff] }
  0x97   : > { %1286 = vmatpush2.msra.mxu0 %v730_v63  ;;  %1433 = vmatpush2.msra.mxu1 %v796_v0  ;;  %v210_v63 = vld [vmem:[%s2409_s29 + $0x88] sm:$0xff]  ;;  %v419_v4 = vmul.f32 %v2445_v24, %v208_v60 }
  0x98   : > { %1287 = vmatprep.subr.mxu0 %v729_v1  ;;  %1434 = vmatprep.subr.mxu1 %v795_v2  ;;  %v843_v0 = vld [vmem:[%s3709_s1 + $0x8e8] sm:$0xff]  ;;  %v422_v1 = vmul.f32 %v2540_v5, %v211_v57  ;;  %v220_v2 = vld [vmem:[%s2409_s29 + $0xd8] sm:$0xff] }
  0x99   : > { %1288 = vmatpush2.msra.mxu0 %v728_v9  ;;  %1435 = vmatpush2.msra.mxu1 %v794_v12  ;;  %v222_v9 = vld [vmem:[%s2409_s29 + $0xe8] sm:$0xff]  ;;  %v841_v12 = vld [vmem:[%s3709_s1 + $0x8d8] sm:$0xff] }
  0x9a   : > { %1073 = vmatprep.mubr.f32.mxu0 %v537_v13  ;;  %1222 = vmatprep.mubr.f32.mxu1 %v539_v14  ;;  %v421_v13 = vmul.f32 %v2543_v6, %v210_v63  ;;  %v219_v14 = vld [vmem:[%s2409_s29 + $0xd0] sm:$0xff]  ;;  %v252_v57 = vld [vmem:[%s2409_s29 + $0x1d8] sm:$0xff]  ;;  %v827_v60 = vld [vmem:[%s3709_s1 + $0x868] sm:$0xff] }
  0x9b   : > { %1289 = vmatprep.subr.mxu0 %v727_v15  ;;  %1436 = vmatprep.subr.mxu1 %v793_v16  ;;  %v840_v15 = vld [vmem:[%s3709_s1 + $0x8d0] sm:$0xff]  ;;  %v431_v16 = vmul.f32 %v2442_v23, %v220_v2  ;;  %v463_v2 = vmul.f32 %v2445_v24, %v252_v57 }
  0x9c   : > { %1074 = vmatmul.mubr.f32.gmra.mxu0 %v536_v17  ;;  %1223 = vmatmul.mubr.f32.gmra.mxu1 %v538_v18  ;;  %v839_v17 = vld [vmem:[%s3709_s1 + $0x8c8] sm:$0xff]  ;;  %v433_v18 = vmul.f32 %v2540_v5, %v222_v9  ;;  %v263_v9 = vld [vmem:[%s2409_s29 + $0x230] sm:$0xff] }
  0x9d   : > { %1290 = vmatpush2.msra.mxu0 %v726_v27  ;;  %1437 = vmatpush2.msra.mxu1 %v792_v28  ;;  %v430_v27 = vmul.f32 %v2445_v24, %v219_v14  ;;  %v231_v28 = vld [vmem:[%s2409_s29 + $0x130] sm:$0xff]  ;;  %v266_v14 = vld [vmem:[%s2409_s29 + $0x248] sm:$0xff] }
  0x9e   : > { %1291 = vmatprep.subr.mxu0 %v725_v29  ;;  %1438 = vmatprep.subr.mxu1 %v791_v30  ;;  %v837_v29 = vld [vmem:[%s3709_s1 + $0x8b8] sm:$0xff]  ;;  %v233_v30 = vld [vmem:[%s2409_s29 + $0x140] sm:$0xff] }
  0x9f   : > { %1292 = vmatpush2.msra.mxu0 %v724_v33  ;;  %1439 = vmatpush2.msra.mxu1 %v790_v34  ;;  %v432_v33 = vmul.f32 %v2543_v6, %v221_v25  ;;  %v230_v34 = vld [vmem:[%s2409_s29 + $0x128] sm:$0xff]  ;;  %v474_v25 = vmul.f32 %v2445_v24, %v263_v9 }
  0xa0   : > { %1079 = vmatprep.mubr.f32.mxu0 %v548_v35  ;;  %1228 = vmatprep.mubr.f32.mxu1 %v550_v36  ;;  %v835_v35 = vld [vmem:[%s3709_s1 + $0x8a8] sm:$0xff]  ;;  %v442_v36 = vmul.f32 %v2442_v23, %v231_v28  ;;  %v477_v28 = vmul.f32 %v2540_v5, %v266_v14 }
  0xa1   : > { %1293 = vmatprep.subr.mxu0 %v723_v37  ;;  %1440 = vmatprep.subr.mxu1 %v789_v38  ;;  %v232_v37 = vld [vmem:[%s2409_s29 + $0x138] sm:$0xff]  ;;  %v892_v38 = vld [vmem:[%s3709_s1 + $0xa70] sm:$0xff] }
  0xa2   : > { %1080 = vmatmul.mubr.f32.gmra.mxu0 %v547_v39  ;;  %1229 = vmatmul.mubr.f32.gmra.mxu1 %v549_v19  ;;  %v444_v39 = vmul.f32 %v2540_v5, %v233_v30  ;;  %v242_v19 = vld [vmem:[%s2409_s29 + $0x188] sm:$0xff]  ;;  %v888_v30 = vld [vmem:[%s3709_s1 + $0xa50] sm:$0xff] }
  0xa3   : > { %1294 = vmatpush2.msra.mxu0 %v722_v20  ;;  %1441 = vmatpush2.msra.mxu1 %v788_v40  ;;  %v834_v20 = vld [vmem:[%s3709_s1 + $0x8a0] sm:$0xff]  ;;  %v441_v40 = vmul.f32 %v2445_v24, %v230_v34 }
  0xa4   : > { %1295 = vmatprep.subr.mxu0 %v721_v21  ;;  %1442 = vmatprep.subr.mxu1 %v787_v22  ;;  %v443_v21 = vmul.f32 %v2543_v6, %v232_v37  ;;  %v241_v22 = vld [vmem:[%s2409_s29 + $0x180] sm:$0xff] }
  0xa5   : > { %1296 = vmatpush2.msra.mxu0 %v720_v43  ;;  %1443 = vmatpush2.msra.mxu1 %v786_v44  ;;  %v453_v43 = vmul.f32 %v2442_v23, %v242_v19  ;;  %v244_v44 = vld [vmem:[%s2409_s29 + $0x198] sm:$0xff]  ;;  %v452_v48 = vmul.f32 %v2445_v24, %v241_v22  ;;  %v286_v19 = vld [vmem:[%s2409_s29 + $0x2e8] sm:$0xff] }
  0xa6   : > { %1297 = vmatprep.subr.mxu0 %v719_v45  ;;  %1444 = vmatprep.subr.mxu1 %v785_v46  ;;  %v180_v45 = vld [vmem:[%s3708_s0 + $0x8] sm:$0x7]  ;;  %v455_v53 = vmul.f32 %v2540_v5, %v244_v44  ;;  %v288_v22 = vld [vmem:[%s2409_s29 + $0x2f8] sm:$0xff]  ;;  %v497_v44 = vmul.f32 %v2442_v23, %v286_v19 }
  0xa7   : > { %1298 = vmatpush2.msra.mxu0 %v718_v49  ;;  %1299 = vmatprep.mubr.f32.mxu0 %v409_v47  ;;  %v831_v46 = vld [vmem:[%s3709_s1 + $0x888] sm:$0xff]  ;;  %v830_v47 = vld [vmem:[%s3709_s1 + $0x880] sm:$0xff] }
  0xa8   : > { %1445 = vmatpush2.msra.mxu1 %v784_v52  ;;  %1300 = vmatmul.mubr.f32.vlgmr.msra.gmra.mxu0 %v408_v50  ;;  %v891_v49 = vld [vmem:[%s3709_s1 + $0xa68] sm:$0xff]  ;;  %v243_v50 = vld [vmem:[%s2409_s29 + $0x190] sm:$0xff]  ;;  %v829_v52 = vld [vmem:[%s3709_s1 + $0x878] sm:$0xff] }
  0xa9   : > { %1446 = vmatprep.subr.mxu1 %v783_v54  ;;  %1533 = vmatprep.subr.mxu0 %v845_v55  ;;  %v255_v54 = vld [vmem:[%s2409_s29 + $0x1f0] sm:$0xff]  ;;  %v1927_v55 = vmul.f32 -1.442695, %v180_v45 }
  0xaa   : > { %1447 = vmatpush2.msra.mxu1 %v782_v58  ;;  %1448 = vmatprep.mubr.f32.mxu1 %v411_v56  ;;  %v828_v56 = vld [vmem:[%s3709_s1 + $0x870] sm:$0xff]  ;;  %v890_v58 = vld [vmem:[%s3709_s1 + $0xa60] sm:$0xff]  ;;  %v466_v63 = vmul.f32 %v2540_v5, %v255_v54 }
  0xab   : > { %1534 = vmatpush1.msra.mxu0 %v844_v61  ;;  %1449 = vmatmul.mubr.f32.vlgmr.msra.gmra.mxu1 %v410_v59  ;;  %v454_v59 = vmul.f32 %v2543_v6, %v243_v50  ;;  %v464_v61 = vmul.f32 %v2442_v23, %v253_v51  ;;  %1959 = vpow2.f32 %v1927_v55  ;;  %v287_v45 = vld [vmem:[%s2409_s29 + $0x2f0] sm:$0xff]  ;;  %v886_v50 = vld [vmem:[%s3709_s1 + $0xa40] sm:$0xff]  ;;  %v499_v51 = vmul.f32 %v2540_v5, %v288_v22  ;;  %v296_v55 = vld [vmem:[%s2409_s29 + $0x338] sm:$0xff] }
  0xac   : > { %1535 = vmatprep.subr.mxu0 %v843_v0  ;;  %1305 = vmatprep.mubr.f32.mxu0 %v420_v62  ;;  %v264_v62 = vld [vmem:[%s2409_s29 + $0x238] sm:$0xff]  ;;  %v254_v0 = vld [vmem:[%s2409_s29 + $0x1e8] sm:$0xff]  ;;  %v498_v54 = vmul.f32 %v2543_v6, %v287_v45 }
  0xad   : > { %1536 = vmatpush1.msra.mxu0 %v842_v3  ;;  %1454 = vmatprep.mubr.f32.mxu1 %v422_v1  ;;  %v826_v1 = vld [vmem:[%s3709_s1 + $0x860] sm:$0xff]  ;;  %v825_v3 = vld [vmem:[%s3709_s1 + $0x858] sm:$0xff] }
  0xae   : > { %1306 = vmatmul.mubr.f32.gmra.mxu0 %v419_v4  ;;  %1537 = vmatprep.subr.mxu0 %v841_v12  ;;  %v475_v4 = vmul.f32 %v2442_v23, %v264_v62  ;;  %v824_v12 = vld [vmem:[%s3709_s1 + $0x850] sm:$0xff]  ;;  %v874_v62 = vld [vmem:[%s3709_s1 + $0x9e0] sm:$0xff] }
  0xaf   : > { %1538 = vmatpush1.msra.mxu0 %v840_v15  ;;  %1455 = vmatmul.mubr.f32.gmra.mxu1 %v421_v13  ;;  %v465_v13 = vmul.f32 %v2543_v6, %v254_v0  ;;  %v823_v15 = vld [vmem:[%s3709_s1 + $0x848] sm:$0xff]  ;;  %v308_v0 = vld [vmem:[%s2409_s29 + $0x398] sm:$0xff] }
  0xb0   : > { %1539 = vmatprep.subr.mxu0 %v839_v17  ;;  %1311 = vmatprep.mubr.f32.mxu0 %v431_v16  ;;  %v265_v16 = vld [vmem:[%s2409_s29 + $0x240] sm:$0xff]  ;;  %v519_v14 = vmul.f32 %v2442_v23, %v308_v0  ;;  %v202_v0 = vld [vmem:[%s2409_s29 + $0x48] sm:$0xff] }
  0xb1   : > { %1540 = vmatpush1.msra.mxu0 %v838_v26  ;;  %1460 = vmatprep.mubr.f32.mxu1 %v433_v18  ;;  %v822_v17 = vld [vmem:[%s3709_s1 + $0x840] sm:$0xff]  ;;  %v889_v18 = vld [vmem:[%s3709_s1 + $0xa58] sm:$0xff]  ;;  %v275_v26 = vld [vmem:[%s2409_s29 + $0x290] sm:$0xff] }
  0xb2   : > { %1312 = vmatmul.mubr.f32.gmra.mxu0 %v430_v27  ;;  %1541 = vmatprep.subr.mxu0 %v837_v29  ;;  %v821_v27 = vld [vmem:[%s3709_s1 + $0x838] sm:$0xff]  ;;  %v277_v29 = vld [vmem:[%s2409_s29 + $0x2a0] sm:$0xff]  ;;  %v486_v34 = vmul.f32 %v2442_v23, %v275_v26 }
  0xb3   : > { %1542 = vmatpush1.msra.mxu0 %v836_v31  ;;  %1698 = vmatprep.subr.mxu1 %v893_v32  ;;  %v476_v31 = vmul.f32 %v2543_v6, %v265_v16  ;;  %v274_v32 = vld [vmem:[%s2409_s29 + $0x288] sm:$0xff]  ;;  %v488_v37 = vmul.f32 %v2540_v5, %v277_v29  ;;  %v884_v16 = vld [vmem:[%s3709_s1 + $0xa30] sm:$0xff] }
  0xb4   : > { %1461 = vmatmul.mubr.f32.gmra.mxu1 %v432_v33  ;;  %1543 = vmatprep.subr.mxu0 %v835_v35  ;;  %v820_v33 = vld [vmem:[%s3709_s1 + $0x830] sm:$0xff]  ;;  %v276_v35 = vld [vmem:[%s2409_s29 + $0x298] sm:$0xff]  ;;  %v318_v29 = vld [vmem:[%s2409_s29 + $0x3e8] sm:$0xff] }
  0xb5   : > { %1699 = vmatpush1.msra.mxu1 %v892_v38  ;;  %1317 = vmatprep.mubr.f32.mxu0 %v442_v36  ;;  %v819_v36 = vld [vmem:[%s3709_s1 + $0x828] sm:$0xff]  ;;  %v818_v38 = vld [vmem:[%s3709_s1 + $0x820] sm:$0xff] }
  0xb6   : > { %1544 = vmatpush1.msra.mxu0 %v834_v20  ;;  %1466 = vmatprep.mubr.f32.mxu1 %v444_v39  ;;  %v485_v39 = vmul.f32 %v2445_v24, %v274_v32  ;;  %v817_v20 = vld [vmem:[%s3709_s1 + $0x818] sm:$0xff]  ;;  %v321_v32 = vld [vmem:[%s2409_s29 + $0x400] sm:$0xff] }
  0xb7   : > { %1318 = vmatmul.mubr.f32.gmra.mxu0 %v441_v40  ;;  %1545 = vmatprep.subr.mxu0 %v833_v41  ;;  %v487_v40 = vmul.f32 %v2543_v6, %v276_v35  ;;  %v285_v41 = vld [vmem:[%s2409_s29 + $0x2e0] sm:$0xff]  ;;  %v529_v35 = vmul.f32 %v2445_v24, %v318_v29  ;;  %v532_v19 = vmul.f32 %v2540_v5, %v321_v32 }
  0xb8   : > { %1546 = vmatpush1.msra.mxu0 %v832_v42  ;;  %1467 = vmatmul.mubr.f32.gmra.mxu1 %v443_v21  ;;  %v816_v21 = vld [vmem:[%s3709_s1 + $0x810] sm:$0xff]  ;;  %v815_v42 = vld [vmem:[%s3709_s1 + $0x808] sm:$0xff]  ;;  %v225_v29 = vld [vmem:[%s2409_s29 + $0x100] sm:$0xff] }
  0xb9   : > { %1547 = vmatprep.subr.mxu0 %v831_v46  ;;  %1323 = vmatprep.mubr.f32.mxu0 %v453_v43  ;;  %v887_v43 = vld [vmem:[%s3709_s1 + $0xa48] sm:$0xff]  ;;  %v814_v46 = vld [vmem:[%s3709_s1 + $0x800] sm:$0xff] }
  0xba   : > { %1548 = vmatpush1.msra.mxu0 %v830_v47  ;;  %1700 = vmatprep.subr.mxu1 %v891_v49  ;;  %v496_v47 = vmul.f32 %v2445_v24, %v285_v41  ;;  %v1960_v49 = vpop.eup %1959  ;;  %v329_v41 = vld [vmem:[%s2409_s29 + $0x440] sm:$0xff] }
  0xbb   : > { %1324 = vmatmul.mubr.f32.gmra.mxu0 %v452_v48  ;;  %1549 = vmatprep.subr.mxu0 %v829_v52  ;;  %v297_v48 = vld [vmem:[%s2409_s29 + $0x340] sm:$0xff]  ;;  %v299_v52 = vld [vmem:[%s2409_s29 + $0x350] sm:$0xff] }
  0xbc   : > { %1472 = vmatprep.mubr.f32.mxu1 %v455_v53  ;;  %1550 = vmatpush1.msra.mxu0 %v828_v56  ;;  %v877_v53 = vld [vmem:[%s3709_s1 + $0x9f8] sm:$0xff]  ;;  %v876_v56 = vld [vmem:[%s3709_s1 + $0x9f0] sm:$0xff]  ;;  %v508_v57 = vmul.f32 %v2442_v23, %v297_v48  ;;  %v540_v48 = vmul.f32 %v2445_v24, %v329_v41 }
  0xbd   : > { %1701 = vmatpush1.msra.mxu1 %v890_v58  ;;  %1551 = vmatprep.subr.mxu0 %v827_v60  ;;  %v188_v58 = vadd.f32 1.0, %v1960_v49  ;;  %v510_v60 = vmul.f32 %v2540_v5, %v299_v52  ;;  %v861_v49 = vld [vmem:[%s3709_s1 + $0x978] sm:$0xff] }
  0xbe   : > { %1473 = vmatmul.mubr.f32.gmra.mxu1 %v454_v59  ;;  %1329 = vmatprep.mubr.f32.mxu0 %v464_v61  ;;  %v875_v59 = vld [vmem:[%s3709_s1 + $0x9e8] sm:$0xff] }
  0xbf   : > { %1552 = vmatpush1.msra.mxu0 %v826_v1  ;;  %1478 = vmatprep.mubr.f32.mxu1 %v466_v63  ;;  %v298_v61 = vld [vmem:[%s2409_s29 + $0x348] sm:$0xff]  ;;  %v507_v63 = vmul.f32 %v2445_v24, %v296_v55  ;;  %v873_v1 = vld [vmem:[%s3709_s1 + $0x9d8] sm:$0xff]  ;;  %1961 = vrcp.f32 %v188_v58  ;;  %v343_v55 = vld [vmem:[%s2409_s29 + $0x4b0] sm:$0xff] }
  0xc0   : > { %1330 = vmatmul.mubr.f32.gmra.mxu0 %v463_v2  ;;  %1553 = vmatprep.subr.mxu0 %v825_v3  ;;  %v310_v2 = vld [vmem:[%s2409_s29 + $0x3a8] sm:$0xff]  ;;  %v872_v3 = vld [vmem:[%s3709_s1 + $0x9d0] sm:$0xff]  ;;  %v509_v9 = vmul.f32 %v2543_v6, %v298_v61  ;;  %v881_v58 = vld [vmem:[%s3709_s1 + $0xa18] sm:$0xff]  ;;  %v554_v61 = vmul.f32 %v2540_v5, %v343_v55 }
  0xc1   : > { %1554 = vmatpush1.msra.mxu0 %v824_v12  ;;  %1335 = vmatprep.mubr.f32.mxu0 %v475_v4  ;;  %v885_v4 = vld [vmem:[%s3709_s1 + $0xa38] sm:$0xff]  ;;  %v307_v12 = vld [vmem:[%s2409_s29 + $0x390] sm:$0xff] }
  0xc2   : > { %1479 = vmatmul.mubr.f32.gmra.mxu1 %v465_v13  ;;  %1555 = vmatprep.subr.mxu0 %v823_v15  ;;  %v871_v13 = vld [vmem:[%s3709_s1 + $0x9c8] sm:$0xff]  ;;  %v309_v15 = vld [vmem:[%s2409_s29 + $0x3a0] sm:$0xff]  ;;  %v518_v26 = vmul.f32 %v2445_v24, %v307_v12  ;;  %v852_v12 = vld [vmem:[%s3709_s1 + $0x930] sm:$0xff] }
  0xc3   : > { %1556 = vmatpush1.msra.mxu0 %v822_v17  ;;  %1702 = vmatprep.subr.mxu1 %v889_v18  ;;  %v521_v17 = vmul.f32 %v2540_v5, %v310_v2  ;;  %v319_v18 = vld [vmem:[%s2409_s29 + $0x3f0] sm:$0xff] }
  0xc4   : > { %1336 = vmatmul.mubr.f32.gmra.mxu0 %v474_v25  ;;  %1557 = vmatprep.subr.mxu0 %v821_v27  ;;  %v870_v25 = vld [vmem:[%s3709_s1 + $0x9c0] sm:$0xff]  ;;  %v869_v27 = vld [vmem:[%s3709_s1 + $0x9b8] sm:$0xff]  ;;  %v203_v2 = vld [vmem:[%s2409_s29 + $0x50] sm:$0xff] }
  0xc5   : > { %1703 = vmatpush1.msra.mxu1 %v888_v30  ;;  %1484 = vmatprep.mubr.f32.mxu1 %v477_v28  ;;  %v520_v28 = vmul.f32 %v2543_v6, %v309_v15  ;;  %v868_v30 = vld [vmem:[%s3709_s1 + $0x9b0] sm:$0xff]  ;;  %v214_v15 = vld [vmem:[%s2409_s29 + $0xa8] sm:$0xff] }
  0xc6   : > { %1558 = vmatpush1.msra.mxu0 %v820_v33  ;;  %1485 = vmatmul.mubr.f32.gmra.mxu1 %v476_v31  ;;  %v530_v31 = vmul.f32 %v2442_v23, %v319_v18  ;;  %v867_v33 = vld [vmem:[%s3709_s1 + $0x9a8] sm:$0xff]  ;;  %v849_v18 = vld [vmem:[%s3709_s1 + $0x918] sm:$0xff] }
  0xc7   : > { %1559 = vmatprep.subr.mxu0 %v819_v36  ;;  %1341 = vmatprep.mubr.f32.mxu0 %v486_v34  ;;  %v866_v34 = vld [vmem:[%s3709_s1 + $0x9a0] sm:$0xff]  ;;  %v883_v36 = vld [vmem:[%s3709_s1 + $0xa28] sm:$0xff] }
  0xc8   : > { %1560 = vmatpush1.msra.mxu0 %v818_v38  ;;  %1490 = vmatprep.mubr.f32.mxu1 %v488_v37  ;;  %v320_v37 = vld [vmem:[%s2409_s29 + $0x3f8] sm:$0xff]  ;;  %v330_v38 = vld [vmem:[%s2409_s29 + $0x448] sm:$0xff] }
  0xc9   : > { %1342 = vmatmul.mubr.f32.gmra.mxu0 %v485_v39  ;;  %1561 = vmatprep.subr.mxu0 %v817_v20  ;;  %v865_v39 = vld [vmem:[%s3709_s1 + $0x998] sm:$0xff]  ;;  %v531_v22 = vmul.f32 %v2543_v6, %v320_v37 }
  0xca   : > { %1562 = vmatpush1.msra.mxu0 %v816_v21  ;;  %1491 = vmatmul.mubr.f32.gmra.mxu1 %v487_v40  ;;  %v332_v20 = vld [vmem:[%s2409_s29 + $0x458] sm:$0xff]  ;;  %v864_v40 = vld [vmem:[%s3709_s1 + $0x990] sm:$0xff]  ;;  %v882_v21 = vld [vmem:[%s3709_s1 + $0xa20] sm:$0xff] }
  0xcb   : > { %1563 = vmatprep.subr.mxu0 %v815_v42  ;;  %1704 = vmatprep.subr.mxu1 %v887_v43  ;;  %v863_v42 = vld [vmem:[%s3709_s1 + $0x988] sm:$0xff]  ;;  %v541_v43 = vmul.f32 %v2442_v23, %v330_v38  ;;  %v543_v45 = vmul.f32 %v2540_v5, %v332_v20 }
  0xcc   : > { %1347 = vmatprep.mubr.f32.mxu0 %v497_v44  ;;  %1564 = vmatpush1.msra.mxu0 %v814_v46  ;;  %v341_v44 = vld [vmem:[%s2409_s29 + $0x4a0] sm:$0xff]  ;;  %v331_v46 = vld [vmem:[%s2409_s29 + $0x450] sm:$0xff]  ;;  %v1962_v52 = vpop.eup %1961  ;;  %v855_v5 = vld [vmem:[%s3709_s1 + $0x948] sm:$0xff] }
  0xcd   : > { %1705 = vmatpush1.msra.mxu1 %v886_v50  ;;  %1348 = vmatmul.mubr.f32.gmra.mxu0 %v496_v47  ;;  %v862_v47 = vld [vmem:[%s3709_s1 + $0x980] sm:$0xff]  ;;  %v552_v50 = vmul.f32 %v2442_v23, %v341_v44  ;;  %v258_v44 = vld [vmem:[%s2409_s29 + $0x208] sm:$0xff] }
  0xce   : > { %1565 = vmatprep.subr.mxu0 %v877_v53  ;;  %1496 = vmatprep.mubr.f32.mxu1 %v499_v51  ;;  %v340_v51 = vld [vmem:[%s2409_s29 + $0x498] sm:$0xff]  ;;  %v860_v53 = vld [vmem:[%s3709_s1 + $0x970] sm:$0xff]  ;;  %v858_v23 = vld [vmem:[%s3709_s1 + $0x960] sm:$0xff] }
  0xcf   : > { %1566 = vmatpush2.msra.mxu0 %v876_v56  ;;  %1497 = vmatmul.mubr.f32.gmra.mxu1 %v498_v54  ;;  %v542_v54 = vmul.f32 %v2543_v6, %v331_v46  ;;  %v859_v56 = vld [vmem:[%s3709_s1 + $0x968] sm:$0xff] }
  0xd0   : > { %1567 = vmatprep.subr.mxu0 %v875_v59  ;;  %1353 = vmatprep.mubr.f32.mxu0 %v508_v57  ;;  %v342_v57 = vld [vmem:[%s2409_s29 + $0x4a8] sm:$0xff]  ;;  %v551_v59 = vmul.f32 %v2445_v24, %v340_v51 }
  0xd1   : > { %1568 = vmatpush2.msra.mxu0 %v874_v62  ;;  %1502 = vmatprep.mubr.f32.mxu1 %v510_v60  ;;  %v857_v60 = vld [vmem:[%s3709_s1 + $0x958] sm:$0xff]  ;;  %v3255_v62 = vrot.slane %v1962_v52, %v355_v8  ;;  %v553_v24 = vmul.f32 %v2543_v6, %v342_v57  ;;  %v856_v8 = vld [vmem:[%s3709_s1 + $0x950] sm:$0xff]  ;;  %v879_v6 = vld [vmem:[%s3709_s1 + $0xa08] sm:$0xff] }
  0xd2   : > { %1354 = vmatmul.mubr.f32.gmra.mxu0 %v507_v63  ;;  %1569 = vmatprep.subr.mxu0 %v873_v1  ;;  %v880_v63 = vld [vmem:[%s3709_s1 + $0xa10] sm:$0xff]  ;;  %v3264_v1 = vrot.slane %v1962_v52, %v359_v11  ;;  %v854_v11 = vld [vmem:[%s3709_s1 + $0x940] sm:$0xff] }
  0xd3   : > { %1570 = vmatpush2.msra.mxu0 %v872_v3  ;;  %1706 = vmatprep.subr.mxu1 %v885_v4  ;;  %v878_v3 = vld [vmem:[%s3709_s1 + $0xa00] sm:$0xff]  ;;  %v413_v4 = vmul.f32 %v3255_v62, %v202_v0  ;;  %v278_v0 = vld [vmem:[%s2409_s29 + $0x2a8] sm:$0xff] }
  0xd4   : > { %1503 = vmatmul.mubr.f32.gmra.mxu1 %v509_v9  ;;  %1571 = vmatprep.subr.mxu0 %v871_v13  ;;  %v853_v9 = vld [vmem:[%s3709_s1 + $0x938] sm:$0xff]  ;;  %v414_v13 = vmul.f32 %v3264_v1, %v203_v2 }
  0xd5   : > { %1707 = vmatpush1.msra.mxu1 %v884_v16  ;;  %1359 = vmatprep.mubr.f32.mxu0 %v519_v14  ;;  %v851_v14 = vld [vmem:[%s3709_s1 + $0x928] sm:$0xff]  ;;  %v3296_v16 = vrot.slane %v1962_v52, %v351_v10  ;;  %v213_v10 = vld [vmem:[%s2409_s29 + $0xa0] sm:$0xff] }
  0xd6   : > { %1572 = vmatpush2.msra.mxu0 %v870_v25  ;;  %1508 = vmatprep.mubr.f32.mxu1 %v521_v17  ;;  %v850_v17 = vld [vmem:[%s3709_s1 + $0x920] sm:$0xff]  ;;  %v1971_v25 = vmov 0.0   ;;  %v424_v32 = vmul.f32 %v3255_v62, %v213_v10  ;;  %v324_v10 = vld [vmem:[%s2409_s29 + $0x418] sm:$0xff] }
  0xd7   : > { %1360 = vmatmul.mubr.f32.gmra.mxu0 %v518_v26  ;;  %1573 = vmatprep.subr.mxu0 %v869_v27  ;;  %v201_v26 = vld [vmem:[%s2409_s29 + $0x40] sm:$0xff]  ;;  %v425_v27 = vmul.f32 %v3264_v1, %v214_v15  ;;  %v489_v2 = vmul.f32 %v3296_v16, %v278_v0  ;;  %v300_v15 = vld [vmem:[%s2409_s29 + $0x358] sm:$0xff] }
  0xd8   : > { %1574 = vmatpush2.msra.mxu0 %v868_v30  ;;  %1509 = vmatmul.mubr.f32.gmra.mxu1 %v520_v28  ;;  %v847_v28 = vld [vmem:[%s3709_s1 + $0x908] sm:$0xff]  ;;  %v846_v30 = vld [vmem:[%s3709_s1 + $0x900] sm:$0xff] }
  0xd9   : > { %1575 = vmatprep.subr.mxu0 %v867_v33  ;;  %1365 = vmatprep.mubr.f32.mxu0 %v530_v31  ;;  %v412_v31 = vmul.f32 %v3296_v16, %v201_v26  ;;  %v212_v33 = vld [vmem:[%s2409_s29 + $0x98] sm:$0xff] }
  0xda   : > { %1576 = vmatpush2.msra.mxu0 %v866_v34  ;;  %1708 = vmatprep.subr.mxu1 %v883_v36  ;;  %v224_v34 = vld [vmem:[%s2409_s29 + $0xf8] sm:$0xff]  ;;  %v423_v37 = vmul.f32 %v3296_v16, %v212_v33 }
  0xdb   : > { %1366 = vmatmul.mubr.f32.gmra.mxu0 %v529_v35  ;;  %1577 = vmatprep.subr.mxu0 %v865_v39  ;;  %v436_v35 = vmul.f32 %v3264_v1, %v225_v29  ;;  %v236_v36 = vld [vmem:[%s2409_s29 + $0x158] sm:$0xff]  ;;  %v435_v38 = vmul.f32 %v3255_v62, %v224_v34  ;;  %v223_v39 = vld [vmem:[%s2409_s29 + $0xf0] sm:$0xff] }
  0xdc   : > { %1514 = vmatprep.mubr.f32.mxu1 %v532_v19  ;;  %1578 = vmatpush2.msra.mxu0 %v864_v40  ;;  %v235_v19 = vld [vmem:[%s2409_s29 + $0x150] sm:$0xff]  ;;  %v447_v20 = vmul.f32 %v3264_v1, %v236_v36  ;;  %v434_v41 = vmul.f32 %v3296_v16, %v223_v39  ;;  %v322_v39 = vld [vmem:[%s2409_s29 + $0x408] sm:$0xff] }
  0xdd   : > { %1709 = vmatpush1.msra.mxu1 %v882_v21  ;;  %1579 = vmatprep.subr.mxu0 %v863_v42  ;;  %v247_v40 = vld [vmem:[%s2409_s29 + $0x1b0] sm:$0xff]  ;;  %v446_v21 = vmul.f32 %v3255_v62, %v235_v19  ;;  %v246_v42 = vld [vmem:[%s2409_s29 + $0x1a8] sm:$0xff] }
  0xde   : > { %1515 = vmatmul.mubr.f32.gmra.mxu1 %v531_v22  ;;  %1371 = vmatprep.mubr.f32.mxu0 %v541_v43  ;;  %v234_v22 = vld [vmem:[%s2409_s29 + $0x148] sm:$0xff]  ;;  %v458_v43 = vmul.f32 %v3264_v1, %v247_v40  ;;  %v457_v46 = vmul.f32 %v3255_v62, %v246_v42  ;;  %v323_v34 = vld [vmem:[%s2409_s29 + $0x410] sm:$0xff] }
  0xdf   : > { %1580 = vmatpush2.msra.mxu0 %v862_v47  ;;  %1520 = vmatprep.mubr.f32.mxu1 %v543_v45  ;;  %v445_v45 = vmul.f32 %v3296_v16, %v234_v22  ;;  %v245_v47 = vld [vmem:[%s2409_s29 + $0x1a0] sm:$0xff]  ;;  %v335_v36 = vld [vmem:[%s2409_s29 + $0x470] sm:$0xff]  ;;  %v334_v19 = vld [vmem:[%s2409_s29 + $0x468] sm:$0xff] }
  0xe0   : > { %1372 = vmatmul.mubr.f32.gmra.mxu0 %v540_v48  ;;  %1581 = vmatprep.subr.mxu0 %v861_v49  ;;  %v257_v48 = vld [vmem:[%s2409_s29 + $0x200] sm:$0xff]  ;;  %v469_v49 = vmul.f32 %v3264_v1, %v258_v44  ;;  %v456_v51 = vmul.f32 %v3296_v16, %v245_v47  ;;  %v346_v40 = vld [vmem:[%s2409_s29 + $0x4c8] sm:$0xff] }
  0xe1   : > { %1582 = vmatpush2.msra.mxu0 %v860_v53  ;;  %1377 = vmatprep.mubr.f32.mxu0 %v552_v50  ;;  %v269_v50 = vld [vmem:[%s2409_s29 + $0x260] sm:$0xff]  ;;  %v468_v52 = vmul.f32 %v3255_v62, %v257_v48  ;;  %v256_v53 = vld [vmem:[%s2409_s29 + $0x1f8] sm:$0xff] }
  0xe2   : > { %1521 = vmatmul.mubr.f32.gmra.mxu1 %v542_v54  ;;  %1583 = vmatprep.subr.mxu0 %v859_v56  ;;  %v268_v54 = vld [vmem:[%s2409_s29 + $0x258] sm:$0xff]  ;;  %v480_v55 = vmul.f32 %v3264_v1, %v269_v50  ;;  %v467_v57 = vmul.f32 %v3296_v16, %v256_v53  ;;  %v333_v22 = vld [vmem:[%s2409_s29 + $0x460] sm:$0xff] }
  0xe3   : > { %1584 = vmatpush2.msra.mxu0 %v858_v23  ;;  %1710 = vmatprep.subr.mxu1 %v881_v58  ;;  %v280_v56 = vld [vmem:[%s2409_s29 + $0x2b8] sm:$0xff]  ;;  %v479_v23 = vmul.f32 %v3255_v62, %v268_v54  ;;  %v267_v58 = vld [vmem:[%s2409_s29 + $0x250] sm:$0xff]  ;;  %v345_v44 = vld [vmem:[%s2409_s29 + $0x4c0] sm:$0xff] }
  0xe4   : > { %1378 = vmatmul.mubr.f32.gmra.mxu0 %v551_v59  ;;  %1585 = vmatprep.subr.mxu0 %v857_v60  ;;  %v279_v59 = vld [vmem:[%s2409_s29 + $0x2b0] sm:$0xff]  ;;  %v491_v60 = vmul.f32 %v3264_v1, %v280_v56 }
  0xe5   : > { %1711 = vmatpush1.msra.mxu1 %v880_v63  ;;  %1526 = vmatprep.mubr.f32.mxu1 %v554_v61  ;;  %v291_v61 = vld [vmem:[%s2409_s29 + $0x310] sm:$0xff]  ;;  %v478_v63 = vmul.f32 %v3296_v16, %v267_v58 }
  0xe6   : > { %1586 = vmatpush2.msra.mxu0 %v856_v8  ;;  %1527 = vmatmul.mubr.f32.gmra.mxu1 %v553_v24  ;;  %v490_v24 = vmul.f32 %v3255_v62, %v279_v59  ;;  %v290_v8 = vld [vmem:[%s2409_s29 + $0x308] sm:$0xff] }
  0xe7   : > { %1587 = vmatprep.subr.mxu0 %v855_v5  ;;  %1712 = vmatprep.subr.mxu1 %v879_v6  ;;  %v502_v5 = vmul.f32 %v3264_v1, %v291_v61  ;;  %v302_v6 = vld [vmem:[%s2409_s29 + $0x368] sm:$0xff] }
  0xe8   : > { %1588 = vmatpush2.msra.mxu0 %v854_v11  ;;  %1713 = vmatpush1.msra.mxu1 %v878_v3  ;;  %v501_v11 = vmul.f32 %v3255_v62, %v290_v8  ;;  %v289_v3 = vld [vmem:[%s2409_s29 + $0x300] sm:$0xff] }
  0xe9   : > { %1589 = vmatprep.subr.mxu0 %v853_v9  ;;  %1597 = vmatprep.mubr.f32.mxu0 %v413_v4  ;;  %v301_v4 = vld [vmem:[%s2409_s29 + $0x360] sm:$0xff]  ;;  %v513_v9 = vmul.f32 %v3264_v1, %v302_v6 }
  0xea   : > { %1590 = vmatpush2.msra.mxu0 %v852_v12  ;;  %1746 = vmatprep.mubr.f32.mxu1 %v1971_v25  ;;  %v313_v12 = vld [vmem:[%s2409_s29 + $0x3c0] sm:$0xff] }
  0xeb   : > { %1591 = vmatprep.subr.mxu0 %v851_v14  ;;  %1928 = vmatmul.mubr.msk.f32.vlgmr.msra.gmra.mxu1 %vm894_vm0, %v414_v13  ;;  %v500_v13 = vmul.f32 %v3296_v16, %v289_v3  ;;  %v512_v14 = vmul.f32 %v3255_v62, %v301_v4 }
  0xec   : > { %1592 = vmatpush2.msra.mxu0 %v850_v17  ;;  %1752 = vmatprep.mubr.f32.mxu1 %v1971_v25  ;;  %v312_v17 = vld [vmem:[%s2409_s29 + $0x3b8] sm:$0xff] }
  0xed   : > { %1593 = vmatprep.subr.mxu0 %v849_v18  ;;  %v524_v18 = vmul.f32 %v3264_v1, %v313_v12 }
  0xee   : > { %1594 = vmatpush2.msra.mxu0 %v848_v7 }
  0xef   : > { %1595 = vmatprep.subr.mxu0 %v847_v28  ;;  %1929 = vmatmul.mubr.msk.f32.gmra.mxu1 %vm894_vm0, %v425_v27  ;;  %v511_v28 = vmul.f32 %v3296_v16, %v300_v15 }
  0xf0   : > { %1596 = vmatpush2.msra.mxu0 %v846_v30  ;;  %1758 = vmatprep.mubr.f32.mxu1 %v1971_v25 }
  0xf1   : > { %1598 = vmatmul.mubr.f32.vlgmr.msra.gmra.mxu0 %v412_v31  ;;  %v523_v31 = vmul.f32 %v3255_v62, %v312_v17 }
  0xf2   : > { %1603 = vmatprep.mubr.f32.mxu0 %v424_v32  ;;  %v311_v32 = vld [vmem:[%s2409_s29 + $0x3b0] sm:$0xff] }
  0xf3   : > { %1930 = vmatmul.mubr.msk.f32.gmra.mxu1 %vm894_vm0, %v436_v35  ;;  %v535_v35 = vmul.f32 %v3264_v1, %v324_v10 }
  0xf4   : > { %1764 = vmatprep.mubr.f32.mxu1 %v1971_v25 }
  0xf5   : > { %1604 = vmatmul.mubr.f32.gmra.mxu0 %v423_v37  ;;  %v522_v37 = vmul.f32 %v3296_v16, %v311_v32 }
  0xf6   : > { %1609 = vmatprep.mubr.f32.mxu0 %v435_v38  ;;  %v534_v38 = vmul.f32 %v3255_v62, %v323_v34 }
  0xf7   : > { %1931 = vmatmul.mubr.msk.f32.gmra.mxu1 %vm894_vm0, %v447_v20  ;;  %v546_v20 = vmul.f32 %v3264_v1, %v335_v36 }
  0xf8   : > { %1770 = vmatprep.mubr.f32.mxu1 %v1971_v25 }
  0xf9   : > { %1610 = vmatmul.mubr.f32.gmra.mxu0 %v434_v41  ;;  %v533_v41 = vmul.f32 %v3296_v16, %v322_v39 }
  0xfa   : > { %1615 = vmatprep.mubr.f32.mxu0 %v446_v21  ;;  %v545_v21 = vmul.f32 %v3255_v62, %v334_v19 }
  0xfb   : > { %1932 = vmatmul.mubr.msk.f32.gmra.mxu1 %vm894_vm0, %v458_v43 }
  0xfc   : > { %1776 = vmatprep.mubr.f32.mxu1 %v1971_v25 }
  0xfd   : > { %1616 = vmatmul.mubr.f32.gmra.mxu0 %v445_v45  ;;  %v557_v45 = vmul.f32 %v3264_v1, %v346_v40 }
  0xfe   : > { %1621 = vmatprep.mubr.f32.mxu0 %v457_v46 }
  0xff   : > { %1933 = vmatmul.mubr.msk.f32.gmra.mxu1 %vm894_vm0, %v469_v49  ;;  %v544_v49 = vmul.f32 %v3296_v16, %v333_v22 }
 0x100   : > { %1782 = vmatprep.mubr.f32.mxu1 %v1971_v25 }
 0x101   : > { %1622 = vmatmul.mubr.f32.gmra.mxu0 %v456_v51  ;;  %v556_v51 = vmul.f32 %v3255_v62, %v345_v44 }
 0x102   : > { %1627 = vmatprep.mubr.f32.mxu0 %v468_v52  ;;  %v344_v52 = vld [vmem:[%s2409_s29 + $0x4b8] sm:$0xff]  ;;  %s1944_s29 = sshll.u32 %s3777_s19, 4 }
 0x103   : > { %1934 = vmatmul.mubr.msk.f32.gmra.mxu1 %vm894_vm0, %v480_v55  ;;  %v555_v1 = vmul.f32 %v3296_v16, %v344_v52  ;;  %s3587_s11 = scalar_lea.vmem %s3711_s3, %s1944_s29 }
 0x104   : > { %1788 = vmatprep.mubr.f32.mxu1 %v1971_v25 }
 0x105   : > { %1628 = vmatmul.mubr.f32.gmra.mxu0 %v467_v57 }
 0x106   : > { %1633 = vmatprep.mubr.f32.mxu0 %v479_v23 }
 0x107   : > { %1935 = vmatmul.mubr.msk.f32.gmra.mxu1 %vm894_vm0, %v491_v60 }
 0x108   : > { %1794 = vmatprep.mubr.f32.mxu1 %v1971_v25 }
 0x109   : > { %1634 = vmatmul.mubr.f32.gmra.mxu0 %v478_v63 }
 0x10a   : > { %1639 = vmatprep.mubr.f32.mxu0 %v490_v24 }
 0x10b   : > { %1936 = vmatmul.mubr.msk.f32.gmra.mxu1 %vm894_vm0, %v502_v5 }
 0x10c   : > { %1800 = vmatprep.mubr.f32.mxu1 %v1971_v25 }
 0x10d   : > { %1640 = vmatmul.mubr.f32.gmra.mxu0 %v489_v2 }
 0x10e   : > { %1645 = vmatprep.mubr.f32.mxu0 %v501_v11 }
 0x10f   : > { %1937 = vmatmul.mubr.msk.f32.gmra.mxu1 %vm894_vm0, %v513_v9  ;;  %v1003_v26 = vpop.f32.mrf.mxu0  ;;  %v1152_v7 = vpop.f32.mrf.mxu1 }
 0x110   : > { %1806 = vmatprep.mubr.f32.mxu1 %v1971_v25  ;;  %v3392_v27 = vadd.f32 %v1152_v7, %v1003_v26 }
 0x111   : > { %1646 = vmatmul.mubr.f32.gmra.mxu0 %v500_v13  ;;  %v1005_v29 = vpop.f32.mrf.mxu0  ;;  %v1154_v30 = vpop.f32.mrf.mxu1 }
 0x112   : > { %1651 = vmatprep.mubr.f32.mxu0 %v512_v14  ;;  %v3397_v33 = vadd.f32 %v1154_v30, %v1005_v29 }
 0x113   : > { %1938 = vmatmul.mubr.msk.f32.gmra.mxu1 %vm894_vm0, %v524_v18 }
 0x114   : > { %1812 = vmatprep.mubr.f32.mxu1 %v1971_v25 }
 0x115   : > { %1652 = vmatmul.mubr.f32.gmra.mxu0 %v511_v28 }
 0x116   : > { %1657 = vmatprep.mubr.f32.mxu0 %v523_v31 }
 0x117   : > { %1939 = vmatmul.mubr.msk.f32.gmra.mxu1 %vm894_vm0, %v535_v35 }
 0x118   : > { %1818 = vmatprep.mubr.f32.mxu1 %v1971_v25 }
 0x119   : > { %1658 = vmatmul.mubr.f32.gmra.mxu0 %v522_v37 }
 0x11a   : > { %1663 = vmatprep.mubr.f32.mxu0 %v534_v38  ;;  %v1009_v42 = vpop.f32.mrf.mxu0  ;;  %v1158_v43 = vpop.f32.mrf.mxu1 }
 0x11b   : > { %1940 = vmatmul.mubr.msk.f32.gmra.mxu1 %vm894_vm0, %v546_v20  ;;  %v3418_v46 = vadd.f32 %v1158_v43, %v1009_v42 }
 0x11c   : > { %1824 = vmatprep.mubr.f32.mxu1 %v1971_v25  ;;  %v1011_v47 = vpop.f32.mrf.mxu0  ;;  %v1160_v48 = vpop.f32.mrf.mxu1 }
 0x11d   : > { %1664 = vmatmul.mubr.f32.gmra.mxu0 %v533_v41  ;;  %v3422_v50 = vadd.f32 %v1160_v48, %v1011_v47 }
 0x11e   : > { %1669 = vmatprep.mubr.f32.mxu0 %v545_v21 }
 0x11f   : > { %1941 = vmatmul.mubr.msk.f32.gmra.mxu1 %vm894_vm0, %v557_v45 }
 0x120   : > { %v1015_v53 = vpop.f32.mrf.mxu0  ;;  %v1164_v54 = vpop.f32.mrf.mxu1 }
 0x121   : > { %1670 = vmatmul.mubr.f32.gmra.mxu0 %v544_v49  ;;  %v3428_v55 = vadd.f32 %v1164_v54, %v1015_v53 }
 0x122   : > { %1675 = vmatprep.mubr.f32.mxu0 %v556_v51  ;;  %v1017_v25 = vpop.f32.mrf.mxu0  ;;  %v1166_v56 = vpop.f32.mrf.mxu1 }
 0x123   : > { %v3430_v57 = vadd.f32 %v1166_v56, %v1017_v25 }
 0x125   : > { %1676 = vmatmul.mubr.f32.gmra.mxu0 %v555_v1 }
 0x126   : > { %v1021_v23 = vpop.f32.mrf.mxu0  ;;  %v1170_v58 = vpop.f32.mrf.mxu1 }
 0x127   : > { %v3432_v59 = vadd.f32 %v1170_v58, %v1021_v23 }
 0x128   : > { %v1023_v62 = vpop.f32.mrf.mxu0  ;;  %v1172_v60 = vpop.f32.mrf.mxu1 }
 0x129   : > { %v3434_v61 = vadd.f32 %v1172_v60, %v1023_v62 }
 0x12c   : > { %v1027_v63 = vpop.f32.mrf.mxu0  ;;  %v1176_v24 = vpop.f32.mrf.mxu1 }
 0x12d   : > { %v3436_v0 = vadd.f32 %v1176_v24, %v1027_v63 }
 0x12e   : > { %v1029_v16 = vpop.f32.mrf.mxu0  ;;  %v1178_v8 = vpop.f32.mrf.mxu1 }
 0x12f   : > { %v3438_v5 = vadd.f32 %v1178_v8, %v1029_v16 }
 0x132   : > { %v1033_v6 = vpop.f32.mrf.mxu0  ;;  %v1182_v2 = vpop.f32.mrf.mxu1 }
 0x133   : > { %v3440_v11 = vadd.f32 %v1182_v2, %v1033_v6 }
 0x134   : > { %v1035_v3 = vpop.f32.mrf.mxu0  ;;  %v1184_v4 = vpop.f32.mrf.mxu1 }
 0x135   : > { %v3442_v9 = vadd.f32 %v1184_v4, %v1035_v3 }
 0x138   : > { %v1039_v12 = vpop.f32.mrf.mxu0  ;;  %v1188_v13 = vpop.f32.mrf.mxu1 }
 0x139   : > { %v3444_v14 = vadd.f32 %v1188_v13, %v1039_v12 }
 0x13a   : > { %v1041_v15 = vpop.f32.mrf.mxu0  ;;  %v1190_v17 = vpop.f32.mrf.mxu1 }
 0x13b   : > { %v3446_v18 = vadd.f32 %v1190_v17, %v1041_v15 }
 0x13e   : > { %v1045_v26 = vpop.f32.mrf.mxu0  ;;  %v1194_v7 = vpop.f32.mrf.mxu1 }
 0x13f   : > { %v3448_v10 = vadd.f32 %v1194_v7, %v1045_v26 }
 0x140   : > { %v1047_v28 = vpop.f32.mrf.mxu0  ;;  %v1196_v29 = vpop.f32.mrf.mxu1 }
 0x141   : > { %v3450_v30 = vadd.f32 %v1196_v29, %v1047_v28 }
 0x144   : > { %v1051_v31 = vpop.f32.mrf.mxu0  ;;  %v1200_v32 = vpop.f32.mrf.mxu1 }
 0x145   : > { %v3452_v34 = vadd.f32 %v1200_v32, %v1051_v31 }
 0x146   : > { %v1053_v35 = vpop.f32.mrf.mxu0  ;;  %v1202_v36 = vpop.f32.mrf.mxu1 }
 0x147   : > { %v3454_v37 = vadd.f32 %v1202_v36, %v1053_v35 }
 0x14a   : > { %v1057_v38 = vpop.f32.mrf.mxu0  ;;  %v1206_v39 = vpop.f32.mrf.mxu1 }
 0x14b   : > { %v3456_v19 = vadd.f32 %v1206_v39, %v1057_v38 }
 0x14c   : > { %v1059_v20 = vpop.f32.mrf.mxu0  ;;  %v1208_v40 = vpop.f32.mrf.mxu1 }
 0x14d   : > { %3712 = vst [vmem:[#allocation2_spill] sm:$0xff] %v3456_v19  ;;  %v3458_v41 = vadd.f32 %v1208_v40, %v1059_v20 }
 0x14f   : > { %3713 = vst [vmem:[#allocation3_spill] sm:$0xff] %v3458_v41 }
 0x150   : > { %v1063_v21 = vpop.f32.mrf.mxu0  ;;  %v1212_v22 = vpop.f32.mrf.mxu1 }
 0x151   : > { %v3460_v42 = vadd.f32 %v1212_v22, %v1063_v21 }
 0x152   : > { %v1065_v43 = vpop.f32.mrf.mxu0  ;;  %v1214_v44 = vpop.f32.mrf.mxu1 }
 0x153   : > { %3714 = vst [vmem:[#allocation4_spill] sm:$0xff] %v3460_v42  ;;  %v3462_v45 = vadd.f32 %v1214_v44, %v1065_v43 }
 0x155   : > { %3715 = vst [vmem:[#allocation5_spill] sm:$0xff] %v3462_v45 }
 0x156   : > { %v1069_v47 = vpop.f32.mrf.mxu0  ;;  %v1218_v48 = vpop.f32.mrf.mxu1 }
 0x157   : > { %v3464_v49 = vadd.f32 %v1218_v48, %v1069_v47 }
 0x158   : > { %v1071_v51 = vpop.f32.mrf.mxu0  ;;  %v1220_v52 = vpop.f32.mrf.mxu1 }
 0x159   : > { %3716 = vst [vmem:[#allocation6_spill] sm:$0xff] %v3464_v49  ;;  %v3466_v53 = vadd.f32 %v1220_v52, %v1071_v51 }
 0x15b   : > { %3717 = vst [vmem:[#allocation7_spill] sm:$0xff] %v3466_v53 }
 0x15c   : > { %v1075_v54 = vpop.f32.mrf.mxu0  ;;  %v1224_v1 = vpop.f32.mrf.mxu1 }
 0x15d   : > { %v3468_v25 = vadd.f32 %v1224_v1, %v1075_v54 }
 0x15e   : > { %v1077_v56 = vpop.f32.mrf.mxu0  ;;  %v1226_v23 = vpop.f32.mrf.mxu1 }
 0x15f   : > { %3718 = vst [vmem:[#allocation8_spill] sm:$0xff] %v3468_v25  ;;  %v3470_v58 = vadd.f32 %v1226_v23, %v1077_v56 }
 0x161   : > { %3719 = vst [vmem:[#allocation9_spill] sm:$0xff] %v3470_v58 }
 0x162   : > { %v1081_v62 = vpop.f32.mrf.mxu0  ;;  %v1230_v60 = vpop.f32.mrf.mxu1 }
 0x163   : > { %v3472_v63 = vadd.f32 %v1230_v60, %v1081_v62 }
 0x164   : > { %v1083_v24 = vpop.f32.mrf.mxu0  ;;  %v1232_v16 = vpop.f32.mrf.mxu1 }
 0x165   : > { %3720 = vst [vmem:[#allocation10_spill] sm:$0xff] %v3472_v63  ;;  %v3474_v8 = vadd.f32 %v1232_v16, %v1083_v24 }
 0x167   : > { %3721 = vst [vmem:[#allocation11_spill] sm:$0xff] %v3474_v8 }
 0x168   : > { %v1301_v6 = vpop.f32.mrf.mxu0 }
 0x16a   : > { %v1303_v2 = vpop.f32.mrf.mxu0 }
 0x16b   : > { %v1450_v3 = vpop.f32.mrf.mxu1 }
 0x16d   : > { %v3476_v4 = vpop.f32.mrf.mxu1 }
 0x16e   : > { %v1307_v12 = vpop.f32.mrf.mxu0 }
 0x16f   : > { %v3478_v13 = vpop.f32.mrf.mxu1 }
 0x170   : > { %v1309_v15 = vpop.f32.mrf.mxu0 }
 0x171   : > { %v3480_v17 = vpop.f32.mrf.mxu1 }
 0x172   : > { %v3482_v26 = vpop.f32.mrf.mxu0 }
 0x174   : > { %v3484_v7 = vpop.f32.mrf.mxu0  ;;  %v3486_v28 = vpop.f32.mrf.mxu1 }
 0x176   : > { %v3488_v29 = vpop.f32.mrf.mxu1 }
 0x177   : > { %v3490_v31 = vpop.f32.mrf.mxu0 }
 0x178   : > { %v3492_v32 = vpop.f32.mrf.mxu1 }
 0x179   : > { %v3494_v35 = vpop.f32.mrf.mxu0 }
 0x17a   : > { %v3496_v36 = vpop.f32.mrf.mxu1 }
 0x17b   : > { %v3498_v38 = vpop.f32.mrf.mxu0 }
 0x17d   : > { %v3500_v39 = vpop.f32.mrf.mxu0 }
 0x17e   : > { %v3502_v20 = vpop.f32.mrf.mxu1 }
 0x180   : > { %v3504_v40 = vpop.f32.mrf.mxu0  ;;  %v3506_v21 = vpop.f32.mrf.mxu1 }
 0x182   : > { %v3508_v22 = vpop.f32.mrf.mxu0  ;;  %v3510_v43 = vpop.f32.mrf.mxu1 }
 0x184   : > { %v3512_v44 = vpop.f32.mrf.mxu0  ;;  %v3514_v47 = vpop.f32.mrf.mxu1 }
 0x186   : > { %v3516_v48 = vpop.f32.mrf.mxu0  ;;  %v3518_v51 = vpop.f32.mrf.mxu1 }
 0x188   : > { %v3520_v52 = vpop.f32.mrf.mxu1 }
 0x189   : > { %v3522_v54 = vpop.f32.mrf.mxu0 }
 0x18a   : > { %v3524_v1 = vpop.f32.mrf.mxu1 }
 0x18b   : > { %v3526_v56 = vpop.f32.mrf.mxu0 }
 0x18c   : > { %v3528_v23 = vpop.f32.mrf.mxu1 }
 0x18d   : > { %v3530_v62 = vpop.f32.mrf.mxu0 }
 0x18f   : > { %v3532_v60 = vpop.f32.mrf.mxu0  ;;  %v3534_v24 = vpop.f32.mrf.mxu1 }
 0x190   : > { %3722 = vst [vmem:[#allocation12_spill] sm:$0xff] %v3532_v60  ;;  %3723 = vst [vmem:[#allocation13_spill] sm:$0xff] %v3534_v24 }
 0x191   : > { %v3536_v16 = vpop.f32.mrf.mxu1 }
 0x192   : > { %3724 = vst [vmem:[#allocation14_spill] sm:$0xff] %v3536_v16  ;;  %v3538_v8 = vpop.f32.mrf.mxu0 }
 0x193   : > { %3725 = vst [vmem:[#allocation15_spill] sm:$0xff] %v3538_v8 }
 0x194   : > { %v3540_v63 = vpop.f32.mrf.mxu0  ;;  %v3542_v58 = vpop.f32.mrf.mxu1 }
 0x195   : > { %3726 = vst [vmem:[#allocation16_spill] sm:$0xff] %v3540_v63  ;;  %3727 = vst [vmem:[#allocation17_spill] sm:$0xff] %v3542_v58 }
 0x196   : > { %v3544_v25 = vpop.f32.mrf.mxu1 }
 0x197   : > { %3728 = vst [vmem:[#allocation18_spill] sm:$0xff] %v3544_v25  ;;  %v3546_v53 = vpop.f32.mrf.mxu0 }
 0x198   : > { %3729 = vst [vmem:[#allocation19_spill] sm:$0xff] %v3546_v53  ;;  %v3548_v49 = vpop.f32.mrf.mxu1 }
 0x199   : > { %3730 = vst [vmem:[#allocation20_spill] sm:$0xff] %v3548_v49  ;;  %v3550_v45 = vpop.f32.mrf.mxu0 }
 0x19a   : > { %3731 = vst [vmem:[#allocation21_spill] sm:$0xff] %v3550_v45  ;;  %v3552_v42 = vpop.f32.mrf.mxu1 }
 0x19b   : > { %3732 = vst [vmem:[#allocation22_spill] sm:$0xff] %v3552_v42  ;;  %v3554_v41 = vpop.f32.mrf.mxu0 }
 0x19c   : > { %3733 = vst [vmem:[#allocation23_spill] sm:$0xff] %v3554_v41 }
 0x19d   : > { %v3558_v16 = vpop.f32.mrf.mxu0 }
 0x19e   : > { %v3556_v19 = vpop.f32.mrf.mxu1  ;;  %3735 = vst [vmem:[#allocation25_spill] sm:$0xff] %v3558_v16  ;;  %v1302_v16 = vadd.f32 %v1301_v6, %v3392_v27 }
 0x19f   : > { %3734 = vst [vmem:[#allocation24_spill] sm:$0xff] %v3556_v19 }
 0x1a0   : > { %v3560_v8 = vpop.f32.mrf.mxu1  ;;  %v3564_v25 = vpop.f32.mrf.mxu0 }
 0x1a1   : > { %3736 = vst [vmem:[#allocation26_spill] sm:$0xff] %v3560_v8  ;;  %3738 = vst [vmem:[#allocation28_spill] sm:$0xff] %v3564_v25  ;;  %v1304_v8 = vadd.f32 %v1303_v2, %v3397_v33  ;;  %v1451_v25 = vadd.f32 %v1450_v3, %v1302_v16 }
 0x1a2   : > { %v3562_v58 = vpop.f32.mrf.mxu1  ;;  %v3570_v45 = vpop.f32.mrf.mxu0 }
 0x1a3   : > { %3737 = vst [vmem:[#allocation27_spill] sm:$0xff] %v3562_v58  ;;  %3741 = vst [vmem:[#allocation31_spill] sm:$0xff] %v3570_v45  ;;  %v1453_v45 = vadd.f32 %v3476_v4, %v1304_v8 }
 0x1a4   : > { %v3566_v53 = vpop.f32.mrf.mxu1  ;;  %v3574_v41 = vpop.f32.mrf.mxu0 }
 0x1a5   : > { %3739 = vst [vmem:[#allocation29_spill] sm:$0xff] %v3566_v53  ;;  %3743 = vst [vmem:[#allocation33_spill] sm:$0xff] %v3574_v41  ;;  %v1308_v53 = vadd.f32 %v1307_v12, %v3418_v46  ;;  %v1314_v46 = vadd.f32 %v3482_v26, %v3428_v55  ;;  %v1320_v55 = vadd.f32 %v3490_v31, %v3432_v59 }
 0x1a6   : > { %v3568_v49 = vpop.f32.mrf.mxu1  ;;  %v3578_v24 = vpop.f32.mrf.mxu0  ;;  %v1326_v59 = vadd.f32 %v3498_v38, %v3436_v0  ;;  %v1332_v0 = vadd.f32 %v3504_v40, %v3440_v11  ;;  %v1338_v11 = vadd.f32 %v3512_v44, %v3444_v14  ;;  %v1344_v14 = vadd.f32 %v3522_v54, %v3448_v10 }
 0x1a7   : > { %3740 = vst [vmem:[#allocation30_spill] sm:$0xff] %v3568_v49  ;;  %v1457_v6 = vadd.f32 %v3478_v13, %v1308_v53  ;;  %v1463_v13 = vadd.f32 %v3486_v28, %v1314_v46  ;;  %v1469_v16 = vadd.f32 %v3492_v32, %v1320_v55  ;;  %v1350_v10 = vadd.f32 %v3530_v62, %v3452_v34  ;;  %v3746_v34 = vld [vmem:[#allocation2_spill] sm:$0xff]  ;;  %v3747_v62 = vld [vmem:[#allocation15_spill] sm:$0xff] }
 0x1a8   : > { %v3572_v42 = vpop.f32.mrf.mxu1  ;;  %v1487_v55 = vadd.f32 %v3518_v51, %v1338_v11  ;;  %v3754_v11 = vld [vmem:[#allocation18_spill] sm:$0xff] }
 0x1a9   : > { %3742 = vst [vmem:[#allocation32_spill] sm:$0xff] %v3572_v42  ;;  %v1310_v42 = vadd.f32 %v1309_v15, %v3422_v50 }
 0x1ab   : > { %v1748_v19 = vpop.f32.mrf.mxu1 }
 0x1ad   : > { %v1750_v63 = vpop.f32.mrf.mxu1 }
 0x1af   : > { %v1754_v58 = vpop.f32.mrf.mxu1 }
 0x1b1   : > { %v1599_v49 = vpop.f32.mrf.mxu0  ;;  %v1756_v60 = vpop.f32.mrf.mxu1 }
 0x1b2   : > { %v1600_v41 = vadd.f32 %v1599_v49, %v1451_v25  ;;  %v1459_v49 = vadd.f32 %v3480_v17, %v1310_v42  ;;  %v1316_v25 = vadd.f32 %v3484_v7, %v3430_v57  ;;  %v1322_v57 = vadd.f32 %v3494_v35, %v3434_v61 }
 0x1b3   : > { %v1601_v27 = vpop.f32.mrf.mxu0  ;;  %v1760_v33 = vpop.f32.mrf.mxu1  ;;  %v1328_v61 = vadd.f32 %v3500_v39, %v3438_v5  ;;  %v1334_v5 = vadd.f32 %v3508_v22, %v3442_v9  ;;  %v1340_v9 = vadd.f32 %v3516_v48, %v3446_v18  ;;  %v1346_v18 = vadd.f32 %v3526_v56, %v3450_v30  ;;  %v3744_v30 = vld [vmem:[#allocation12_spill] sm:$0xff] }
 0x1b4   : > { %v1749_v2 = vadd.f32 %v1748_v19, %v1600_v41  ;;  %v1602_v3 = vadd.f32 %v1601_v27, %v1453_v45  ;;  %v1465_v17 = vadd.f32 %v3488_v29, %v1316_v25  ;;  %v1481_v25 = vadd.f32 %v3510_v43, %v1332_v0 }
 0x1b5   : > { %v1605_v8 = vpop.f32.mrf.mxu0  ;;  %v1762_v50 = vpop.f32.mrf.mxu1  ;;  %v1352_v56 = vadd.f32 %v3744_v30, %v3454_v37  ;;  %v3749_v37 = vld [vmem:[#allocation3_spill] sm:$0xff] }
 0x1b6   : > { %1831 = vst [vmem:[%s3587_s11] sm:$0xff] %v1749_v2  ;;  %v1751_v4 = vadd.f32 %v1750_v63, %v1602_v3  ;;  %v1606_v12 = vadd.f32 %v1605_v8, %v1457_v6  ;;  %v1471_v6 = vadd.f32 %v3496_v36, %v1322_v57  ;;  %v1475_v2 = vadd.f32 %v3502_v20, %v1326_v59 }
 0x1b7   : > { %v1607_v15 = vpop.f32.mrf.mxu0  ;;  %v1766_v53 = vpop.f32.mrf.mxu1  ;;  %v1477_v8 = vadd.f32 %v3506_v21, %v1328_v61  ;;  %v1493_v57 = vadd.f32 %v3524_v1, %v1344_v14  ;;  %v3759_v14 = vld [vmem:[#allocation23_spill] sm:$0xff] }
 0x1b8   : > { %1833 = vst.msk [vmem:[%s3587_s11 + $0x8] sm:$0xff] %vm1832_vm1, %v1751_v4  ;;  %v1755_v19 = vadd.f32 %v1754_v58, %v1606_v12  ;;  %v1608_v41 = vadd.f32 %v1607_v15, %v1459_v49  ;;  %v1483_v15 = vadd.f32 %v3514_v47, %v1334_v5  ;;  %v3753_v5 = vld [vmem:[#allocation19_spill] sm:$0xff] }
 0x1b9   : > { %v1611_v42 = vpop.f32.mrf.mxu0  ;;  %v1768_v45 = vpop.f32.mrf.mxu1 }
 0x1ba   : > { %1834 = vst [vmem:[%s3587_s11 + $0x10] sm:$0xff] %v1755_v19  ;;  %v1757_v63 = vadd.f32 %v1756_v60, %v1608_v41  ;;  %v1612_v26 = vadd.f32 %v1611_v42, %v1463_v13  ;;  %v1489_v42 = vadd.f32 %v3520_v52, %v1340_v9 }
 0x1bb   : > { %v1613_v7 = vpop.f32.mrf.mxu0  ;;  %v1772_v28 = vpop.f32.mrf.mxu1 }
 0x1bc   : > { %1835 = vst.msk [vmem:[%s3587_s11 + $0x18] sm:$0xff] %vm1832_vm1, %v1757_v63  ;;  %v1761_v58 = vadd.f32 %v1760_v33, %v1612_v26  ;;  %v1614_v31 = vadd.f32 %v1613_v7, %v1465_v17  ;;  %v1495_v7 = vadd.f32 %v3528_v23, %v1346_v18  ;;  %v3760_v18 = vld [vmem:[#allocation22_spill] sm:$0xff] }
 0x1bd   : > { %v1617_v29 = vpop.f32.mrf.mxu0  ;;  %v1774_v27 = vpop.f32.mrf.mxu1 }
 0x1be   : > { %1836 = vst [vmem:[%s3587_s11 + $0x20] sm:$0xff] %v1761_v58  ;;  %v1763_v35 = vadd.f32 %v1762_v50, %v1614_v31  ;;  %v1618_v60 = vadd.f32 %v1617_v29, %v1469_v16  ;;  %v3745_v58 = vld [vmem:[#allocation13_spill] sm:$0xff]  ;;  %v1356_v29 = vadd.f32 %v3747_v62, %v3746_v34  ;;  %v3768_v34 = vld [vmem:[#allocation31_spill] sm:$0xff] }
 0x1bf   : > { %v1619_v32 = vpop.f32.mrf.mxu0  ;;  %v1778_v46 = vpop.f32.mrf.mxu1  ;;  %v1499_v31 = vadd.f32 %v3745_v58, %v1350_v10 }
 0x1c0   : > { %1837 = vst.msk [vmem:[%s3587_s11 + $0x28] sm:$0xff] %vm1832_vm1, %v1763_v35  ;;  %v1767_v38 = vadd.f32 %v1766_v53, %v1618_v60  ;;  %v1620_v33 = vadd.f32 %v1619_v32, %v1471_v6  ;;  %v3748_v35 = vld [vmem:[#allocation14_spill] sm:$0xff]  ;;  %v3750_v32 = vld [vmem:[#allocation16_spill] sm:$0xff] }
 0x1c1   : > { %v1623_v36 = vpop.f32.mrf.mxu0  ;;  %v1780_v3 = vpop.f32.mrf.mxu1  ;;  %v1501_v60 = vadd.f32 %v3748_v35, %v1352_v56  ;;  %v3770_v35 = vld [vmem:[#allocation10_spill] sm:$0xff] }
 0x1c2   : > { %1838 = vst [vmem:[%s3587_s11 + $0x30] sm:$0xff] %v1767_v38  ;;  %v1769_v39 = vadd.f32 %v1768_v45, %v1620_v33  ;;  %v1624_v50 = vadd.f32 %v1623_v36, %v1475_v2  ;;  %v3751_v36 = vld [vmem:[#allocation17_spill] sm:$0xff] }
 0x1c3   : > { %v1625_v20 = vpop.f32.mrf.mxu0  ;;  %v1784_v49 = vpop.f32.mrf.mxu1 }
 0x1c4   : > { %1839 = vst.msk [vmem:[%s3587_s11 + $0x38] sm:$0xff] %vm1832_vm1, %v1769_v39  ;;  %v1773_v40 = vadd.f32 %v1772_v28, %v1624_v50  ;;  %v1626_v4 = vadd.f32 %v1625_v20, %v1477_v8  ;;  %v3752_v8 = vld [vmem:[#allocation4_spill] sm:$0xff] }
 0x1c5   : > { %v1629_v21 = vpop.f32.mrf.mxu0  ;;  %v1786_v12 = vpop.f32.mrf.mxu1  ;;  %v1362_v39 = vadd.f32 %v3753_v5, %v3752_v8 }
 0x1c6   : > { %1840 = vst [vmem:[%s3587_s11 + $0x40] sm:$0xff] %v1773_v40  ;;  %v1775_v22 = vadd.f32 %v1774_v27, %v1626_v4  ;;  %v1630_v53 = vadd.f32 %v1629_v21, %v1481_v25  ;;  %v3755_v4 = vld [vmem:[#allocation5_spill] sm:$0xff] }
 0x1c7   : > { %v1631_v43 = vpop.f32.mrf.mxu0  ;;  %v1790_v13 = vpop.f32.mrf.mxu1  ;;  %v3756_v21 = vld [vmem:[#allocation21_spill] sm:$0xff] }
 0x1c8   : > { %1841 = vst.msk [vmem:[%s3587_s11 + $0x48] sm:$0xff] %vm1832_vm1, %v1775_v22  ;;  %v1779_v44 = vadd.f32 %v1778_v46, %v1630_v53  ;;  %v1632_v19 = vadd.f32 %v1631_v43, %v1483_v15  ;;  %v1358_v46 = vadd.f32 %v3750_v32, %v3749_v37  ;;  %v3757_v43 = vld [vmem:[#allocation20_spill] sm:$0xff] }
 0x1c9   : > { %v1635_v47 = vpop.f32.mrf.mxu0  ;;  %v1792_v41 = vpop.f32.mrf.mxu1 }
 0x1ca   : > { %1842 = vst [vmem:[%s3587_s11 + $0x50] sm:$0xff] %v1779_v44  ;;  %v1781_v48 = vadd.f32 %v1780_v3, %v1632_v19  ;;  %v1636_v45 = vadd.f32 %v1635_v47, %v1487_v55  ;;  %v1505_v3 = vadd.f32 %v3751_v36, %v1356_v29  ;;  %v1507_v40 = vadd.f32 %v3754_v11, %v1358_v46  ;;  %v3758_v55 = vld [vmem:[#allocation6_spill] sm:$0xff]  ;;  %v3773_v36 = vld [vmem:[#allocation11_spill] sm:$0xff] }
 0x1cb   : > { %v1637_v51 = vpop.f32.mrf.mxu0  ;;  %v1796_v17 = vpop.f32.mrf.mxu1  ;;  %v1368_v44 = vadd.f32 %v3759_v14, %v3758_v55 }
 0x1cc   : > { %1843 = vst.msk [vmem:[%s3587_s11 + $0x58] sm:$0xff] %vm1832_vm1, %v1781_v48  ;;  %v1785_v54 = vadd.f32 %v1784_v49, %v1636_v45  ;;  %v1638_v63 = vadd.f32 %v1637_v51, %v1489_v42  ;;  %v3761_v45 = vld [vmem:[#allocation7_spill] sm:$0xff]  ;;  %v3762_v51 = vld [vmem:[#allocation25_spill] sm:$0xff] }
 0x1cd   : > { %v1641_v52 = vpop.f32.mrf.mxu0  ;;  %v1798_v26 = vpop.f32.mrf.mxu1 }
 0x1ce   : > { %1844 = vst [vmem:[%s3587_s11 + $0x60] sm:$0xff] %v1785_v54  ;;  %v1787_v28 = vadd.f32 %v1786_v12, %v1638_v63  ;;  %v1642_v16 = vadd.f32 %v1641_v52, %v1493_v57  ;;  %v1364_v12 = vadd.f32 %v3756_v21, %v3755_v4  ;;  %v3763_v63 = vld [vmem:[#allocation24_spill] sm:$0xff] }
 0x1cf   : > { %v1643_v1 = vpop.f32.mrf.mxu0  ;;  %v1802_v59 = vpop.f32.mrf.mxu1  ;;  %v1517_v52 = vadd.f32 %v3763_v63, %v1368_v44  ;;  %v3775_v4 = vld [vmem:[#allocation32_spill] sm:$0xff] }
 0x1d0   : > { %1845 = vst.msk [vmem:[%s3587_s11 + $0x68] sm:$0xff] %vm1832_vm1, %v1787_v28  ;;  %v1791_v27 = vadd.f32 %v1790_v13, %v1642_v16  ;;  %v1644_v6 = vadd.f32 %v1643_v1, %v1495_v7  ;;  %v1511_v13 = vadd.f32 %v3757_v43, %v1362_v39  ;;  %v1513_v48 = vadd.f32 %v3760_v18, %v1364_v12  ;;  %v3765_v7 = vld [vmem:[#allocation28_spill] sm:$0xff] }
 0x1d1   : > { %v1647_v23 = vpop.f32.mrf.mxu0  ;;  %v1804_v61 = vpop.f32.mrf.mxu1 }
 0x1d2   : > { %1846 = vst [vmem:[%s3587_s11 + $0x70] sm:$0xff] %v1791_v27  ;;  %v1793_v2 = vadd.f32 %v1792_v41, %v1644_v6  ;;  %v1648_v0 = vadd.f32 %v1647_v23, %v1499_v31  ;;  %v3767_v31 = vld [vmem:[#allocation9_spill] sm:$0xff]  ;;  %v3769_v23 = vld [vmem:[#allocation27_spill] sm:$0xff] }
 0x1d3   : > { %v1649_v38 = vpop.f32.mrf.mxu0  ;;  %v1808_v33 = vpop.f32.mrf.mxu1  ;;  %v1376_v62 = vadd.f32 %v3768_v34, %v3767_v31 }
 0x1d4   : > { %1847 = vst.msk [vmem:[%s3587_s11 + $0x78] sm:$0xff] %vm1832_vm1, %v1793_v2  ;;  %v1797_v50 = vadd.f32 %v1796_v17, %v1648_v0  ;;  %v1650_v20 = vadd.f32 %v1649_v38, %v1501_v60  ;;  %v1370_v17 = vadd.f32 %v3762_v51, %v3761_v45  ;;  %v3771_v60 = vld [vmem:[#allocation33_spill] sm:$0xff] }
 0x1d5   : > { %v1653_v49 = vpop.f32.mrf.mxu0  ;;  %v1810_v25 = vpop.f32.mrf.mxu1  ;;  %v1380_v37 = vadd.f32 %v3771_v60, %v3770_v35  ;;  %v3772_v38 = vld [vmem:[#allocation29_spill] sm:$0xff] }
 0x1d6   : > { %1848 = vst [vmem:[%s3587_s11 + $0x80] sm:$0xff] %v1797_v50  ;;  %v1799_v15 = vadd.f32 %v1798_v26, %v1650_v20  ;;  %v1654_v9 = vadd.f32 %v1653_v49, %v1505_v3  ;;  %v3764_v26 = vld [vmem:[#allocation8_spill] sm:$0xff]  ;;  %v1382_v3 = vadd.f32 %v3578_v24, %v3773_v36  ;;  %v3774_v50 = vld [vmem:[#allocation30_spill] sm:$0xff] }
 0x1d7   : > { %v1655_v22 = vpop.f32.mrf.mxu0  ;;  %v1814_v53 = vpop.f32.mrf.mxu1  ;;  %v1374_v30 = vadd.f32 %v3765_v7, %v3764_v26  ;;  %v1529_v20 = vadd.f32 %v3774_v50, %v1380_v37 }
 0x1d8   : > { %1849 = vst.msk [vmem:[%s3587_s11 + $0x88] sm:$0xff] %vm1832_vm1, %v1799_v15  ;;  %v1803_v19 = vadd.f32 %v1802_v59, %v1654_v9  ;;  %v1656_v47 = vadd.f32 %v1655_v22, %v1507_v40  ;;  %v3766_v59 = vld [vmem:[#allocation26_spill] sm:$0xff]  ;;  %v1531_v21 = vadd.f32 %v3775_v4, %v1382_v3 }
 0x1d9   : > { %v1659_v41 = vpop.f32.mrf.mxu0  ;;  %v1816_v42 = vpop.f32.mrf.mxu1  ;;  %v1519_v58 = vadd.f32 %v3766_v59, %v1370_v17 }
 0x1da   : > { %1850 = vst [vmem:[%s3587_s11 + $0x90] sm:$0xff] %v1803_v19  ;;  %v1805_v57 = vadd.f32 %v1804_v61, %v1656_v47  ;;  %v1660_v10 = vadd.f32 %v1659_v41, %v1511_v13  ;;  %v1523_v61 = vadd.f32 %v3769_v23, %v1374_v30 }
 0x1db   : > { %v1661_v54 = vpop.f32.mrf.mxu0  ;;  %v1820_v1 = vpop.f32.mrf.mxu1 }
 0x1dc   : > { %1851 = vst.msk [vmem:[%s3587_s11 + $0x98] sm:$0xff] %vm1832_vm1, %v1805_v57  ;;  %v1809_v56 = vadd.f32 %v1808_v33, %v1660_v10  ;;  %v1662_v28 = vadd.f32 %v1661_v54, %v1513_v48  ;;  %v1525_v33 = vadd.f32 %v3772_v38, %v1376_v62 }
 0x1dd   : > { %v1665_v16 = vpop.f32.mrf.mxu0  ;;  %v1822_v0 = vpop.f32.mrf.mxu1 }
 0x1de   : > { %1852 = vst [vmem:[%s3587_s11 + $0xa0] sm:$0xff] %v1809_v56  ;;  %v1811_v29 = vadd.f32 %v1810_v25, %v1662_v28  ;;  %v1666_v27 = vadd.f32 %v1665_v16, %v1517_v52 }
 0x1df   : > { %v1667_v6 = vpop.f32.mrf.mxu0  ;;  %v1826_v40 = vpop.f32.mrf.mxu1 }
 0x1e0   : > { %1853 = vst.msk [vmem:[%s3587_s11 + $0xa8] sm:$0xff] %vm1832_vm1, %v1811_v29  ;;  %v1815_v32 = vadd.f32 %v1814_v53, %v1666_v27  ;;  %v1668_v46 = vadd.f32 %v1667_v6, %v1519_v58 }
 0x1e1   : > { %v1671_v2 = vpop.f32.mrf.mxu0  ;;  %v1828_v53 = vpop.f32.mrf.mxu1 }
 0x1e2   : > { %1854 = vst [vmem:[%s3587_s11 + $0xb0] sm:$0xff] %v1815_v32  ;;  %v1817_v8 = vadd.f32 %v1816_v42, %v1668_v46  ;;  %v1672_v5 = vadd.f32 %v1671_v2, %v1523_v61 }
 0x1e3   : > { %v1673_v39 = vpop.f32.mrf.mxu0 }
 0x1e4   : > { %1855 = vst.msk [vmem:[%s3587_s11 + $0xb8] sm:$0xff] %vm1832_vm1, %v1817_v8  ;;  %v1821_v49 = vadd.f32 %v1820_v1, %v1672_v5  ;;  %v1674_v25 = vadd.f32 %v1673_v39, %v1525_v33 }
 0x1e5   : > { %v1677_v11 = vpop.f32.mrf.mxu0 }
 0x1e6   : > { %1856 = vst [vmem:[%s3587_s11 + $0xc0] sm:$0xff] %v1821_v49  ;;  %v1823_v12 = vadd.f32 %v1822_v0, %v1674_v25  ;;  %v1678_v24 = vadd.f32 %v1677_v11, %v1529_v20 }
 0x1e7   : > { %v1679_v15 = vpop.f32.mrf.mxu0 }
 0x1e8   : > { %1857 = vst.msk [vmem:[%s3587_s11 + $0xc8] sm:$0xff] %vm1832_vm1, %v1823_v12  ;;  %v1827_v9 = vadd.f32 %v1826_v40, %v1678_v24  ;;  %v1680_v22 = vadd.f32 %v1679_v15, %v1531_v21 }
 0x1ea   : > { %1858 = vst [vmem:[%s3587_s11 + $0xd0] sm:$0xff] %v1827_v9  ;;  %v1829_v43 = vadd.f32 %v1828_v53, %v1680_v22 }
 0x1ec   : > { %1859 = vst.msk [vmem:[%s3587_s11 + $0xd8] sm:$0xff] %vm1832_vm1, %v1829_v43 }
 0x1ed PF: > { %s13_s12 = sadd.s32 1, %s1969_s12  }
 0x1ee   : > { %p10_p4 = scmp.ge.s32.totalorder %s13_s12, 4  }
 0x1f0   :  { %12 = sbr.rel (!%p10_p4) target bundleno = 1 (0x1), region = 62 }

</bundles_post_ra>
